<compile_context>
chip_gen: v7x
topology: tpu7x:2x2x1
jax: 0.10.0
libtpu: 0.0.40
codegen_flags: <defaults>
</compile_context>

<pallas_src>
import functools

import jax
import jax.numpy as jnp
from jax.experimental import pallas as pl
from jax.experimental.pallas import tpu as pltpu


def _conv_bias_relu_kernel(x_ref, w_ref, b_ref, o_ref, col_ref, *,
                           kh, kw, stride, th, w_out, cin):
    # x_ref  : (H_pad, W_pad, Cin)      padded NHWC image (bf16), batch dim squeezed
    # w_ref  : (Cout, kh*kw*Cin)        weight, K ordered (i, j, ci) (bf16)
    # b_ref  : (Cout, 1)                bias (f32)
    # o_ref  : (Cout, TH*W_out)         lane-dense output slab
    # col_ref: (TH, W_out, kh*kw*Cin)   im2col scratch (bf16)
    t = pl.program_id(1)
    row0 = pl.multiple_of(t * (th * stride), th * stride)
    span_h = (th - 1) * stride + 1
    span_w = (w_out - 1) * stride + 1

    # im2col: gather the kh*kw taps once into VMEM scratch (K on the minor axis),
    # so the conv becomes one big-K MXU matmul instead of kh*kw tiny-K ones.
    for i in range(kh):
        for j in range(kw):
            tap = x_ref[pl.ds(row0 + i, span_h), j:j + span_w, :]
            if stride > 1:
                # TODO(synk): value-level strided slice; default ConvModule cfg is stride=1.
                tap = tap[::stride, ::stride, :]
            k0 = (i * kw + j) * cin
            col_ref[:, :, k0:k0 + cin] = tap

    k = kh * kw * cin
    patch = col_ref[...].reshape(th * w_out, k)                    # (M, K) bf16
    # Single MXU matmul contracting K of both operands -> (Cout, M) lane-dense result;
    # no explicit transpose of the im2col slab is materialized.
    acc = jax.lax.dot_general(w_ref[...], patch,
                              dimension_numbers=(((1,), (1,)), ((), ())),
                              preferred_element_type=jnp.float32)
    acc = jnp.maximum(acc + b_ref[...], 0.0)                       # bias + ReLU fused
    o_ref[...] = acc.astype(o_ref.dtype)


def _pick_row_tile(h_out, w_out, k, *, budget_bytes=4 << 20):
    """Largest divisor th of h_out with a lane-dense slab (th*w_out % 128 == 0) whose
    im2col scratch fits the VMEM budget. Falls back to the full-output block (allowed
    by the (8,128) rule because block dims then equal the array dims)."""
    k_pad = max(128, ((k + 127) // 128) * 128)
    lane_ok = [th for th in range(1, h_out + 1)
               if h_out % th == 0 and (th * w_out) % 128 == 0]
    if lane_ok:
        fitting = [th for th in lane_ok if th * w_out * k_pad * 2 <= budget_bytes]
        return max(fitting) if fitting else min(lane_ok)
    return h_out


def conv_module_forward(x_nchw, weight, bias, *, stride=1, padding=1):
    """ConvModule.forward with default cfg: ReLU(Conv2d(x, W) + b).

    x_nchw : (N, Cin, H, W)      weight : (Cout, Cin, kh, kw)      bias : (Cout,)
    """
    n, cin, h, w = x_nchw.shape
    cout, _, kh, kw = weight.shape

    h_pad, w_pad = h + 2 * padding, w + 2 * padding
    h_out = (h_pad - kh) // stride + 1
    w_out = (w_pad - kw) // stride + 1
    k = kh * kw * cin
    out_dtype = x_nchw.dtype

    # XLA-side layout plumbing: NCHW -> NHWC, zero-pad, bf16 operands.
    x = jnp.transpose(x_nchw, (0, 2, 3, 1)).astype(jnp.bfloat16)
    x = jnp.pad(x, ((0, 0), (padding, padding), (padding, padding), (0, 0)))
    # (Cout, Cin, kh, kw) -> (Cout, kh, kw, Cin) -> (Cout, K); K ordering matches im2col.
    w2 = jnp.transpose(weight, (0, 2, 3, 1)).reshape(cout, k).astype(jnp.bfloat16)
    b2 = bias.astype(jnp.float32).reshape(cout, 1)

    th = _pick_row_tile(h_out, w_out, k)
    n_t = h_out // th

    kernel = functools.partial(_conv_bias_relu_kernel, kh=kh, kw=kw, stride=stride,
                               th=th, w_out=w_out, cin=cin)

    flops = 2 * n * h_out * w_out * cout * k
    bytes_accessed = int(x.size * 2 + w2.size * 2 + b2.size * 4
                         + n * cout * h_out * w_out * jnp.dtype(out_dtype).itemsize)

    out_flat = pl.pallas_call(
        kernel,
        out_shape=jax.ShapeDtypeStruct((n, cout, h_out * w_out), out_dtype),
        grid_spec=pltpu.PrefetchScalarGridSpec(
            num_scalar_prefetch=0,
            grid=(n, n_t),
            in_specs=[
                # Full padded image resident per batch element across the h-tile axis.
                # TODO(synk): halo-tiled pl.Element blocks for very large feature maps
                # so the resident image also fits v7x's 64 MiB VMEM.
                pl.BlockSpec((None, h_pad, w_pad, cin), lambda b, t: (b, 0, 0, 0)),
                pl.BlockSpec((cout, k), lambda b, t: (0, 0)),
                pl.BlockSpec((cout, 1), lambda b, t: (0, 0)),
            ],
            out_specs=pl.BlockSpec((None, cout, th * w_out), lambda b, t: (b, 0, t)),
            scratch_shapes=[pltpu.VMEM((th, w_out, k), jnp.bfloat16)],
        ),
        compiler_params=pltpu.CompilerParams(
            dimension_semantics=("parallel", "parallel"),
            vmem_limit_bytes=32 * 1024 * 1024),
        cost_estimate=pl.CostEstimate(flops=flops, transcendentals=0,
                                      bytes_accessed=bytes_accessed),
    )(x, w2, b2)

    # (N, Cout, H_out*W_out) -> NCHW: pure reshape, no output transpose needed.
    return out_flat.reshape(n, cout, h_out, w_out)


if __name__ == "__main__":
    N, Cin, H, W = 2, 4, 16, 16
    Cout, K = 8, 3
    stride, padding = 1, 1

    key = jax.random.PRNGKey(0)
    kx, kw_, kb = jax.random.split(key, 3)

    x = jax.random.normal(kx, (N, Cin, H, W), dtype=jnp.float32)
    # deterministic kaiming-style init (fan_in = Cin*K*K, relu gain)
    fan_in = Cin * K * K
    std = (2.0 / fan_in) ** 0.5
    weight = jax.random.normal(kw_, (Cout, Cin, K, K), dtype=jnp.float32) * std
    bias = jax.random.normal(kb, (Cout,), dtype=jnp.float32) * 0.01

    out = conv_module_forward(x, weight, bias, stride=stride, padding=padding)
    out = jax.block_until_ready(out)

    # Reference using the same bf16-rounded operands (kernel accumulates in f32).
    xr = x.astype(jnp.bfloat16).astype(jnp.float32)
    wr = weight.astype(jnp.bfloat16).astype(jnp.float32)
    ref = jax.lax.conv_general_dilated(
        xr, wr, window_strides=(stride, stride),
        padding=[(padding, padding), (padding, padding)],
        dimension_numbers=("NCHW", "OIHW", "NCHW"),
        precision=jax.lax.Precision.HIGHEST)
    ref = jnp.maximum(ref + bias[None, :, None, None], 0.0)

    assert out.shape == ref.shape
    assert jnp.allclose(out, ref, atol=2e-2, rtol=2e-2), "mismatch vs reference"

    print("KERNEL_OK")
</pallas_src>

<mosaic_0001>
module attributes {stable_mosaic.version = 11 : i64} {
  func.func @_conv_bias_relu_kernel(%arg0: i32, %arg1: i32, %arg2: memref<1x18x18x4xbf16, #tpu.memory_space<vmem>>, %arg3: memref<8x36xbf16, #tpu.memory_space<vmem>>, %arg4: memref<8x1xf32, #tpu.memory_space<vmem>>, %arg5: memref<1x8x256xf32, #tpu.memory_space<vmem>>, %arg6: memref<16x16x36xbf16, #tpu.memory_space<vmem>>) attributes {dimension_semantics = [#tpu.dimension_semantics<parallel>, #tpu.dimension_semantics<parallel>], iteration_bounds = array<i64: 2, 1>, scalar_prefetch = 0 : i64, scratch_operands = 1 : i64, tpu.core_type = #tpu.core_type<tc>, window_params = [{transform_indices = @transform_0, window_bounds = array<i64: 1, 18, 18, 4>}, {pipeline_mode = #tpu.pipeline_mode<synchronous>, transform_indices = @transform_1, window_bounds = array<i64: 8, 36>}, {pipeline_mode = #tpu.pipeline_mode<synchronous>, transform_indices = @transform_2, window_bounds = array<i64: 8, 1>}, {transform_indices = @transform_3, window_bounds = array<i64: 1, 8, 256>}]} {
    %c16_i32 = arith.constant 16 : i32
    %0 = arith.muli %arg1, %c16_i32 : i32
    %1 = tpu.assume_multiple %0, 16 : i32
    %c0_i32 = arith.constant 0 : i32
    %2 = arith.addi %1, %c0_i32 : i32
    %c0 = arith.constant 0 : index
    %3 = arith.index_cast %2 : i32 to index
    %c0_0 = arith.constant 0 : index
    %c0_1 = arith.constant 0 : index
    %4 = vector.load %arg2[%c0, %3, %c0_0, %c0_1] : memref<1x18x18x4xbf16, #tpu.memory_space<vmem>>, vector<1x16x16x4xbf16>
    %5 = vector.shape_cast %4 : vector<1x16x16x4xbf16> to vector<16x16x4xbf16>
    %c0_2 = arith.constant 0 : index
    %c0_3 = arith.constant 0 : index
    %c0_4 = arith.constant 0 : index
    %6 = vector.load %arg6[%c0_2, %c0_3, %c0_4] : memref<16x16x36xbf16, #tpu.memory_space<vmem>>, vector<16x16x4xbf16>
    tpu.vector_store %arg6[%c0_2, %c0_3, %c0_4], %5 {strides = array<i32>} : memref<16x16x36xbf16, #tpu.memory_space<vmem>>, vector<16x16x4xbf16>,
    %c0_i32_5 = arith.constant 0 : i32
    %7 = arith.addi %1, %c0_i32_5 : i32
    %c0_6 = arith.constant 0 : index
    %8 = arith.index_cast %7 : i32 to index
    %c1 = arith.constant 1 : index
    %c0_7 = arith.constant 0 : index
    %9 = vector.load %arg2[%c0_6, %8, %c1, %c0_7] : memref<1x18x18x4xbf16, #tpu.memory_space<vmem>>, vector<1x16x16x4xbf16>
    %10 = vector.shape_cast %9 : vector<1x16x16x4xbf16> to vector<16x16x4xbf16>
    %c0_8 = arith.constant 0 : index
    %c0_9 = arith.constant 0 : index
    %c4 = arith.constant 4 : index
    %11 = vector.load %arg6[%c0_8, %c0_9, %c4] : memref<16x16x36xbf16, #tpu.memory_space<vmem>>, vector<16x16x4xbf16>
    tpu.vector_store %arg6[%c0_8, %c0_9, %c4], %10 {strides = array<i32>} : memref<16x16x36xbf16, #tpu.memory_space<vmem>>, vector<16x16x4xbf16>,
    %c0_i32_10 = arith.constant 0 : i32
    %12 = arith.addi %1, %c0_i32_10 : i32
    %c0_11 = arith.constant 0 : index
    %13 = arith.index_cast %12 : i32 to index
    %c2 = arith.constant 2 : index
    %c0_12 = arith.constant 0 : index
    %14 = vector.load %arg2[%c0_11, %13, %c2, %c0_12] : memref<1x18x18x4xbf16, #tpu.memory_space<vmem>>, vector<1x16x16x4xbf16>
    %15 = vector.shape_cast %14 : vector<1x16x16x4xbf16> to vector<16x16x4xbf16>
    %c0_13 = arith.constant 0 : index
    %c0_14 = arith.constant 0 : index
    %c8 = arith.constant 8 : index
    %16 = vector.load %arg6[%c0_13, %c0_14, %c8] : memref<16x16x36xbf16, #tpu.memory_space<vmem>>, vector<16x16x4xbf16>
    tpu.vector_store %arg6[%c0_13, %c0_14, %c8], %15 {strides = array<i32>} : memref<16x16x36xbf16, #tpu.memory_space<vmem>>, vector<16x16x4xbf16>,
    %c1_i32 = arith.constant 1 : i32
    %17 = arith.addi %1, %c1_i32 : i32
    %c0_15 = arith.constant 0 : index
    %18 = arith.index_cast %17 : i32 to index
    %c0_16 = arith.constant 0 : index
    %c0_17 = arith.constant 0 : index
    %19 = vector.load %arg2[%c0_15, %18, %c0_16, %c0_17] : memref<1x18x18x4xbf16, #tpu.memory_space<vmem>>, vector<1x16x16x4xbf16>
    %20 = vector.shape_cast %19 : vector<1x16x16x4xbf16> to vector<16x16x4xbf16>
    %c0_18 = arith.constant 0 : index
    %c0_19 = arith.constant 0 : index
    %c12 = arith.constant 12 : index
    %21 = vector.load %arg6[%c0_18, %c0_19, %c12] : memref<16x16x36xbf16, #tpu.memory_space<vmem>>, vector<16x16x4xbf16>
    tpu.vector_store %arg6[%c0_18, %c0_19, %c12], %20 {strides = array<i32>} : memref<16x16x36xbf16, #tpu.memory_space<vmem>>, vector<16x16x4xbf16>,
    %c1_i32_20 = arith.constant 1 : i32
    %22 = arith.addi %1, %c1_i32_20 : i32
    %c0_21 = arith.constant 0 : index
    %23 = arith.index_cast %22 : i32 to index
    %c1_22 = arith.constant 1 : index
    %c0_23 = arith.constant 0 : index
    %24 = vector.load %arg2[%c0_21, %23, %c1_22, %c0_23] : memref<1x18x18x4xbf16, #tpu.memory_space<vmem>>, vector<1x16x16x4xbf16>
    %25 = vector.shape_cast %24 : vector<1x16x16x4xbf16> to vector<16x16x4xbf16>
    %c0_24 = arith.constant 0 : index
    %c0_25 = arith.constant 0 : index
    %c16 = arith.constant 16 : index
    %26 = vector.load %arg6[%c0_24, %c0_25, %c16] : memref<16x16x36xbf16, #tpu.memory_space<vmem>>, vector<16x16x4xbf16>
    tpu.vector_store %arg6[%c0_24, %c0_25, %c16], %25 {strides = array<i32>} : memref<16x16x36xbf16, #tpu.memory_space<vmem>>, vector<16x16x4xbf16>,
    %c1_i32_26 = arith.constant 1 : i32
    %27 = arith.addi %1, %c1_i32_26 : i32
    %c0_27 = arith.constant 0 : index
    %28 = arith.index_cast %27 : i32 to index
    %c2_28 = arith.constant 2 : index
    %c0_29 = arith.constant 0 : index
    %29 = vector.load %arg2[%c0_27, %28, %c2_28, %c0_29] : memref<1x18x18x4xbf16, #tpu.memory_space<vmem>>, vector<1x16x16x4xbf16>
    %30 = vector.shape_cast %29 : vector<1x16x16x4xbf16> to vector<16x16x4xbf16>
    %c0_30 = arith.constant 0 : index
    %c0_31 = arith.constant 0 : index
    %c20 = arith.constant 20 : index
    %31 = vector.load %arg6[%c0_30, %c0_31, %c20] : memref<16x16x36xbf16, #tpu.memory_space<vmem>>, vector<16x16x4xbf16>
    tpu.vector_store %arg6[%c0_30, %c0_31, %c20], %30 {strides = array<i32>} : memref<16x16x36xbf16, #tpu.memory_space<vmem>>, vector<16x16x4xbf16>,
    %c2_i32 = arith.constant 2 : i32
    %32 = arith.addi %1, %c2_i32 : i32
    %c0_32 = arith.constant 0 : index
    %33 = arith.index_cast %32 : i32 to index
    %c0_33 = arith.constant 0 : index
    %c0_34 = arith.constant 0 : index
    %34 = vector.load %arg2[%c0_32, %33, %c0_33, %c0_34] : memref<1x18x18x4xbf16, #tpu.memory_space<vmem>>, vector<1x16x16x4xbf16>
    %35 = vector.shape_cast %34 : vector<1x16x16x4xbf16> to vector<16x16x4xbf16>
    %c0_35 = arith.constant 0 : index
    %c0_36 = arith.constant 0 : index
    %c24 = arith.constant 24 : index
    %36 = vector.load %arg6[%c0_35, %c0_36, %c24] : memref<16x16x36xbf16, #tpu.memory_space<vmem>>, vector<16x16x4xbf16>
    tpu.vector_store %arg6[%c0_35, %c0_36, %c24], %35 {strides = array<i32>} : memref<16x16x36xbf16, #tpu.memory_space<vmem>>, vector<16x16x4xbf16>,
    %c2_i32_37 = arith.constant 2 : i32
    %37 = arith.addi %1, %c2_i32_37 : i32
    %c0_38 = arith.constant 0 : index
    %38 = arith.index_cast %37 : i32 to index
    %c1_39 = arith.constant 1 : index
    %c0_40 = arith.constant 0 : index
    %39 = vector.load %arg2[%c0_38, %38, %c1_39, %c0_40] : memref<1x18x18x4xbf16, #tpu.memory_space<vmem>>, vector<1x16x16x4xbf16>
    %40 = vector.shape_cast %39 : vector<1x16x16x4xbf16> to vector<16x16x4xbf16>
    %c0_41 = arith.constant 0 : index
    %c0_42 = arith.constant 0 : index
    %c28 = arith.constant 28 : index
    %41 = vector.load %arg6[%c0_41, %c0_42, %c28] : memref<16x16x36xbf16, #tpu.memory_space<vmem>>, vector<16x16x4xbf16>
    tpu.vector_store %arg6[%c0_41, %c0_42, %c28], %40 {strides = array<i32>} : memref<16x16x36xbf16, #tpu.memory_space<vmem>>, vector<16x16x4xbf16>,
    %c2_i32_43 = arith.constant 2 : i32
    %42 = arith.addi %1, %c2_i32_43 : i32
    %c0_44 = arith.constant 0 : index
    %43 = arith.index_cast %42 : i32 to index
    %c2_45 = arith.constant 2 : index
    %c0_46 = arith.constant 0 : index
    %44 = vector.load %arg2[%c0_44, %43, %c2_45, %c0_46] : memref<1x18x18x4xbf16, #tpu.memory_space<vmem>>, vector<1x16x16x4xbf16>
    %45 = vector.shape_cast %44 : vector<1x16x16x4xbf16> to vector<16x16x4xbf16>
    %c0_47 = arith.constant 0 : index
    %c0_48 = arith.constant 0 : index
    %c32 = arith.constant 32 : index
    %46 = vector.load %arg6[%c0_47, %c0_48, %c32] : memref<16x16x36xbf16, #tpu.memory_space<vmem>>, vector<16x16x4xbf16>
    tpu.vector_store %arg6[%c0_47, %c0_48, %c32], %45 {strides = array<i32>} : memref<16x16x36xbf16, #tpu.memory_space<vmem>>, vector<16x16x4xbf16>,
    %c0_49 = arith.constant 0 : index
    %c0_50 = arith.constant 0 : index
    %c0_51 = arith.constant 0 : index
    %47 = vector.load %arg6[%c0_49, %c0_50, %c0_51] : memref<16x16x36xbf16, #tpu.memory_space<vmem>>, vector<16x16x36xbf16>
    %48 = vector.shape_cast %47 : vector<16x16x36xbf16> to vector<256x36xbf16>
    %c0_52 = arith.constant 0 : index
    %c0_53 = arith.constant 0 : index
    %49 = vector.load %arg3[%c0_52, %c0_53] : memref<8x36xbf16, #tpu.memory_space<vmem>>, vector<8x36xbf16>
    %cst = arith.constant dense<0.000000e+00> : vector<8x256xf32>
    %50 = tpu.matmul %49, %48, %cst {dimension_numbers = #tpu.dot_dimension_numbers<[1], [1], [0], [0], [0, 0, 1, 0], [], []>} : vector<8x36xbf16>, vector<256x36xbf16>, vector<8x256xf32> -> vector<8x256xf32>
    %c0_54 = arith.constant 0 : index
    %c0_55 = arith.constant 0 : index
    %51 = vector.load %arg4[%c0_54, %c0_55] : memref<8x1xf32, #tpu.memory_space<vmem>>, vector<8x1xf32>
    %52 = vector.broadcast %51 : vector<8x1xf32> to vector<8x256xf32>
    %53 = arith.addf %50, %52 : vector<8x256xf32>
    %cst_56 = arith.constant 0.000000e+00 : f32
    %54 = vector.broadcast %cst_56 : f32 to vector<8x256xf32>
    %55 = arith.maximumf %53, %54 : vector<8x256xf32>
    %c0_57 = arith.constant 0 : index
    %c0_58 = arith.constant 0 : index
    %c0_59 = arith.constant 0 : index
    %56 = vector.load %arg5[%c0_57, %c0_58, %c0_59] : memref<1x8x256xf32, #tpu.memory_space<vmem>>, vector<1x8x256xf32>
    %57 = vector.shape_cast %56 : vector<1x8x256xf32> to vector<8x256xf32>
    %58 = vector.shape_cast %55 : vector<8x256xf32> to vector<1x8x256xf32>
    tpu.vector_store %arg5[%c0_57, %c0_58, %c0_59], %58 {strides = array<i32>} : memref<1x8x256xf32, #tpu.memory_space<vmem>>, vector<1x8x256xf32>,
    return
  }
  func.func @transform_0(%arg0: i32, %arg1: i32) -> (i32, i32, i32, i32) {
    %c0_i32 = arith.constant 0 : i32
    %c0_i32_0 = arith.constant 0 : i32
    %c0_i32_1 = arith.constant 0 : i32
    %c0_i32_2 = arith.constant 0 : i32
    return %arg0, %c0_i32, %c0_i32_0, %c0_i32_1 : i32, i32, i32, i32
  }
  func.func @transform_1(%arg0: i32, %arg1: i32) -> (i32, i32) {
    %c0_i32 = arith.constant 0 : i32
    %c0_i32_0 = arith.constant 0 : i32
    %c0_i32_1 = arith.constant 0 : i32
    return %c0_i32, %c0_i32_0 : i32, i32
  }
  func.func @transform_2(%arg0: i32, %arg1: i32) -> (i32, i32) {
    %c0_i32 = arith.constant 0 : i32
    %c0_i32_0 = arith.constant 0 : i32
    %c0_i32_1 = arith.constant 0 : i32
    return %c0_i32, %c0_i32_0 : i32, i32
  }
  func.func @transform_3(%arg0: i32, %arg1: i32) -> (i32, i32, i32) {
    %c0_i32 = arith.constant 0 : i32
    %c0_i32_0 = arith.constant 0 : i32
    return %arg0, %c0_i32, %arg1 : i32, i32, i32
  }
}

</mosaic_0001>

<bundles_post_ra>
// kernel: tpu_custom_call.1
= control target key start
LH: loop header
LB: loop body
LE: loop exit
PB: predicated region body
PF: predicated region fallthrough
CT: control target
= control target key end

     0   :  { %8 = vsyncpa [#allocation4], 0  ;;  %s4789_s0 = inlined_call_operand.vmem [shape: bf16[2,18,18,4], index: 0, kind: input, shape index: {}]   ;;  %s4790_s1 = inlined_call_operand.vmem [shape: bf16[8,36], index: 1, kind: input, shape index: {}]   ;;  %s4791_s2 = inlined_call_operand.vmem [shape: f32[8,1], index: 2, kind: input, shape index: {}]   ;;  %s4792_s3 = inlined_call_operand.hbm [shape: f32[2,8,256], index: 3, kind: output, shape index: {}]  }
   0x1   :  { %10 = vsyncpa [#allocation4 + $0x1], 0  ;;  %s4033_s12 = smov 0   ;;  %s4035_s13 = smov 0  }
   0x2   :  { %s4037_s14 = smov 0   ;;  %s4039_s15 = smov 0  }
   0x3   :  { %s4041_s16 = smov 0   ;;  %s4043_s17 = smov 0  }
   0x4 LB: > { %s3081_s18 = sadd.s32 4294967295, %s4001_s17   ;;  %s3082_s19 = sadd.s32 4294967294, %s4001_s17   ;;  %s4001_s17 = sphi %s4043_s17, %s16_s17   ;;  %s3997_s16 = sphi %s4041_s16, %s4799_s16   ;;  %s3993_s15 = sphi %s4039_s15, %s4798_s15   ;;  %s3989_s14 = sphi %s4037_s14, %s4797_s14   ;;  %s3985_s13 = sphi %s4035_s13, %s4796_s13   ;;  %s3981_s12 = sphi %s4033_s12, %s4795_s12  }
   0x5   : > { %s28_s20 = sadd.s32 1, %s3997_s16  ;;  %s105_s21 = sadd.s32 1, %s3989_s14 }
   0x6   : > { %p30_p0 = scmp.ge.s32.totalorder %s28_s20, 2  ;;  %p115_p1 = scmp.ne.s32.totalorder %s3989_s14, %s3985_s13 }
   0x7   : > { %p116_p2 = scmp.eq.s32.totalorder %s3081_s18, 1  ;;  %p121_p3 = scmp.ne.s32.totalorder %s3985_s13, %s3981_s12 }
   0x8   : > { %s4801_s20 = smov (%p30_p0, %s28_s20), 0  ;;  %p122_p5 = scmp.eq.s32.totalorder %s3082_s19, 1 }
   0x9   : > { %p4073_p4 = por %p116_p2, %p115_p1  ;;  %s100_s23 = ssub.s32 %s3997_s16, %s4801_s20 }
   0xa   : > { %p3085_p6 = scmp.ge.s32.totalorder %s4001_s17, 1  ;;  %p103_p7 = scmp.eq.s32.totalorder %s100_s23, 0 }
   0xb   : > { %p4080_p8 = por %p122_p5, %p121_p3  ;;  %p154_p9 = scmp.lt.s32.totalorder %s4001_s17, 3 }
   0xc   : > { %s4086_s25 = scalar_select %p103_p7, %s3989_s14, %s105_s21  }
   0xd   : > { %p155_p10 = pnand %p3085_p6, %p154_p9 }
   0xe   : > { %p178_p11 = scmp.lt.s32.totalorder (!%p155_p10), %s3993_s15, 1  ;;  %vm944_vm0 = vcmask (!%p155_p10), 1046528   ;;  %s4003_s4 = smov (!%p155_p10), 12   ;;  %vm510_vm1 = vsmask.f32 (!%p155_p10), 7424  ;;  %vm317_vm2 = vcmask (!%p155_p10), 31744  }
   0xf   : > { %158 = sbr.rel (%p155_p10) target bundleno = 644 (0x284), region = 32  ;;  %s4004_s5 = smov (!%p155_p10), 20   ;;  %vm751_vm3 = vcmask (!%p155_p10), 64544   ;;  %vm1041_vm4 = vcmask (!%p155_p10), 97344   ;;  %vm1222_vm5 = vcmask (!%p155_p10), 130144   ;;  %vm1655_vm6 = vcmask (!%p155_p10), 162944  }
  0x10   : > { %s4005_s6 = smov (!%p155_p10), 8   ;;  %s4006_s7 = smov (!%p155_p10), 4   ;;  %vm1944_vm7 = vcmask (!%p155_p10), 195744   ;;  %vm2125_vm8 = vcmask (!%p155_p10), 228544   ;;  %vm2558_vm9 = vcmask (!%p155_p10), 261344   ;;  %vm2847_vm10 = vcmask (!%p155_p10), 294144  }
  0x11   : > { %s4007_s8 = smov (!%p155_p10), 16   ;;  %s4008_s9 = smov (!%p155_p10), 24   ;;  %vm2887_vm11 = vcmask (!%p155_p10), 293888  }
  0x12   : > { %s4009_s10 = smov (!%p155_p10), 28   ;;  %s4010_s11 = smov (!%p155_p10), 32  }
  0x13   : > { %s3590_s28 = sshll.u32 (!%p155_p10), %s3993_s15, 8 }
  0x16   : > { %s179_s26 = scalar_select %p178_p11, %s3993_s15, 1 }
  0x18   : > { %s3617_s27 = smul.u32 216, %s179_s26  ;;  %s175_s26 = sand.u32 1, %s3985_s13  }
  0x19   : > { %s2985_s15 = scalar_lea.sflag [#allocation4], %s175_s26 }
  0x1a   : > { %s4093_s30 = scalar_lea.vmem %s4789_s0, %s3617_s27  ;;  %s3086_s27 = sshll.u32 %s175_s26, 4 }
  0x1b   : > { %v3683_v0 = vld [vmem:[%s4093_s30 + $0x6c] sm:$0xff]   ;;  %v3686_v3 = vld [vmem:[%s4093_s30 + $0x14] ss:$0 sps:$4 sm:$0x11]   ;;  %v3691_v4 = vld [vmem:[%s4093_s30] sm:$0xff]   ;;  %s177_s29 = scalar_lea.vmem [#allocation3], %s3086_s27 }
  0x1c   : > { %v3684_v1 = vld [vmem:[%s4093_s30 + $0xc] sm:$0xff]   ;;  %1190 = vrot.lane.b32.xlu1 %v3683_v0, %s4003_s4  ;;  %v1849_v6 = vrot.slane %v3686_v3, 1  ;;  %v3687_v7 = vld [vmem:[%s4093_s30] sm:$0xfe]   ;;  %v512_v9 = vshrl.u32 %v3691_v4, 16  ;;  %v514_v13 = vshll.u32 %v3691_v4, 16 }
  0x1d   : > { %1174 = vrot.lane.b32.xlu0 %v3684_v1, %s4003_s4  ;;  %v3685_v2 = vld [vmem:[%s4093_s30 + $0xc] sm:$0xfe]   ;;  %v3688_v8 = vld [vmem:[%s4093_s30 + $0x8] ss:$0 sps:$4 sm:$0x11]   ;;  %v945_v11 = vrot.slane %v3687_v7, 1 }
  0x1e   : > { %v1848_v5 = vrot.slane %v3685_v2, 1  ;;  %v3689_v12 = vld [vmem:[%s4093_s30 + $0x60] sm:$0xfe]   ;;  %v946_v14 = vrot.slane %v3688_v8, 1  ;;  %v516_v17 = vrot.slane %v514_v13, 1  ;;  %v3697_v31 = vld [vmem:[%s4093_s30 + $0x6c] sm:$0xff]  }
  0x1f   : > { %v3690_v15 = vld [vmem:[%s4093_s30 + $0x68] ss:$0 sps:$4 sm:$0x11]   ;;  %v969_v16 = vrot.slane %v3689_v12, 1  ;;  %v3693_v21 = vld [vmem:[%s4093_s30 + $0x6c] sm:$0xfe]  }
  0x20   : > { %v1850_v10 = vsel %vm944_vm0, %v1848_v5, %v1849_v6  ;;  %v947_v18 = vsel %vm944_vm0, %v945_v11, %v946_v14  ;;  %v970_v19 = vrot.slane %v3690_v15, 1  ;;  %v3692_v20 = vld [vmem:[%s4093_s30 + $0x8] ss:$0 sps:$4 sm:$0x11]   ;;  %v517_v23 = vor.u32 %v516_v17, %v512_v9  ;;  %v3695_v27 = vld [vmem:[%s4093_s30 + $0x60] sm:$0xff]   ;;  %v3699_v41 = vld [vmem:[%s4093_s30 + $0xc] sm:$0xff]  }
  0x21   : > { %1896 = vrot.lane.b32.xlu0 %v1850_v10, %s4004_s5  ;;  %993 = vrot.lane.b32.xlu1 %v947_v18, %s4005_s6  ;;  %v519_v24 = vshll.u32 %v3692_v20, 16  ;;  %v3694_v25 = vld [vmem:[%s4093_s30 + $0x74] ss:$0 sps:$4 sm:$0x11]   ;;  %v1872_v26 = vrot.slane %v3693_v21, 1  ;;  %v608_v32 = vshrl.u32 %v3695_v27, 16 }
  0x22   : > { %v971_v22 = vsel %vm944_vm0, %v969_v16, %v970_v19  ;;  %v1873_v29 = vrot.slane %v3694_v25, 1  ;;  %v3696_v30 = vld [vmem:[%s4093_s30 + $0x68] ss:$0 sps:$4 sm:$0x11]   ;;  %v610_v33 = vshll.u32 %v3695_v27, 16  ;;  %v1512_v39 = vshrl.u32 %v3697_v31, 16 }
  0x23   : > { %v521_v28 = vrot.slane %v519_v24, 1  ;;  %v615_v36 = vshll.u32 %v3696_v30, 16  ;;  %v3698_v37 = vld [vmem:[%s4093_s30 + $0x74] ss:$0 sps:$4 sm:$0x11]   ;;  %v1514_v40 = vshll.u32 %v3697_v31, 16 }
  0x24   : > { %v1874_v35 = vsel %vm944_vm0, %v1872_v26, %v1873_v29  ;;  %v612_v38 = vrot.slane %v610_v33, 1  ;;  %v1519_v43 = vshll.u32 %v3698_v37, 16  ;;  %v3700_v46 = vld [vmem:[%s4093_s30 + $0x14] ss:$0 sps:$4 sm:$0x11]   ;;  %v1416_v47 = vshrl.u32 %v3699_v41, 16 }
  0x25   : > { %1009 = vrot.lane.b32.xlu1 %v971_v22, %s4005_s6  ;;  %v522_v34 = vsel %vm510_vm1, %v517_v23, %v521_v28  ;;  %v617_v42 = vrot.slane %v615_v36, 1  ;;  %v1516_v45 = vrot.slane %v1514_v40, 1  ;;  %v1418_v48 = vshll.u32 %v3699_v41, 16  ;;  %v3701_v54 = vld [vmem:[%s4093_s30 + $0x78] sm:$0xff]   ;;  %v3711_v6 = vld [vmem:[%s4093_s30 + $0x6c] sm:$0xff]  }
  0x26   : > { %703 = vrot.lane.b32.xlu0 %v522_v34, %s4006_s7  ;;  %v613_v44 = vor.u32 %v612_v38, %v608_v32  ;;  %v1521_v49 = vrot.slane %v1519_v43, 1  ;;  %v1423_v53 = vshll.u32 %v3700_v46, 16  ;;  %v3703_v58 = vld [vmem:[%s4093_s30 + $0x78] sm:$0xff]   ;;  %v3704_v60 = vld [vmem:[%s4093_s30 + $0x80] ss:$0 sps:$4 sm:$0x11]  }
  0x27   : > { %v1517_v51 = vor.u32 %v1516_v45, %v1512_v39  ;;  %v1420_v52 = vrot.slane %v1418_v48, 1  ;;  %v3702_v59 = vld [vmem:[%s4093_s30 + $0x18] sm:$0xff]   ;;  %v2415_v63 = vshrl.u32 %v3703_v58, 16  ;;  %v2417_v0 = vshll.u32 %v3703_v58, 16  ;;  %v3713_v17 = vld [vmem:[%s4093_s30 + $0xc] sm:$0xff]  }
  0x28   : > { %v618_v50 = vsel %vm510_vm1, %v613_v44, %v617_v42  ;;  %v1425_v57 = vrot.slane %v1423_v53, 1  ;;  %v3705_v61 = vld [vmem:[%s4093_s30 + $0x18] sm:$0xff]   ;;  %v2422_v1 = vshll.u32 %v3704_v60, 16  ;;  %v3706_v2 = vld [vmem:[%s4093_s30 + $0x20] ss:$0 sps:$4 sm:$0x11]  }
  0x29   : > { %1912 = vrot.lane.b32.xlu1 %v1874_v35, %s4004_s5  ;;  %v1522_v55 = vsel %vm510_vm1, %v1517_v51, %v1521_v49  ;;  %v1421_v56 = vor.u32 %v1420_v52, %v1416_v47  ;;  %v2319_v3 = vshrl.u32 %v3705_v61, 16  ;;  %v2321_v4 = vshll.u32 %v3705_v61, 16  ;;  %v3707_v10 = vld [vmem:[%s4093_s30 + $0x78] sm:$0xfe]   ;;  %v3715_v37 = vld [vmem:[%s4093_s30 + $0x6c] sm:$0xfe]  }
  0x2a   : > { %719 = vrot.lane.b32.xlu0 %v618_v50, %s4006_s7  ;;  %v2419_v5 = vrot.slane %v2417_v0, 1  ;;  %v2424_v7 = vrot.slane %v2422_v1, 1  ;;  %v2326_v9 = vshll.u32 %v3706_v2, 16  ;;  %v3708_v12 = vld [vmem:[%s4093_s30 + $0x80] ss:$0 sps:$4 sm:$0x11]  }
  0x2b   : > { %v1426_v62 = vsel %vm510_vm1, %v1421_v56, %v1425_v57  ;;  %v2323_v8 = vrot.slane %v2321_v4, 1  ;;  %v620_v13 = vshrl.u32 %v3711_v6, 16  ;;  %v2775_v16 = vrot.slane %v3707_v10, 1  ;;  %v3709_v20 = vld [vmem:[%s4093_s30 + $0x18] sm:$0xfe]  }
  0x2c   : > { %v2420_v11 = vor.u32 %v2419_v5, %v2415_v63  ;;  %v2328_v15 = vrot.slane %v2326_v9, 1  ;;  %v2776_v19 = vrot.slane %v3708_v12, 1  ;;  %v3710_v21 = vld [vmem:[%s4093_s30 + $0x20] ss:$0 sps:$4 sm:$0x11]   ;;  %v2751_v24 = vrot.slane %v3709_v20, 1 }
  0x2d   : > { %1623 = vrot.lane.b32.xlu1 %v1522_v55, %s4007_s8  ;;  %v2324_v14 = vor.u32 %v2323_v8, %v2319_v3  ;;  %v2752_v25 = vrot.slane %v3710_v21, 1  ;;  %v3712_v26 = vld [vmem:[%s4093_s30 + $0x74] ss:$0 sps:$4 sm:$0x11]   ;;  %v622_v27 = vshll.u32 %v3711_v6, 16  ;;  %v524_v32 = vshrl.u32 %v3713_v17, 16 }
  0x2e   : > { %1607 = vrot.lane.b32.xlu0 %v1426_v62, %s4007_s8  ;;  %v2425_v18 = vsel %vm510_vm1, %v2420_v11, %v2424_v7  ;;  %v2777_v23 = vsel %vm944_vm0, %v2775_v16, %v2776_v19  ;;  %v627_v30 = vshll.u32 %v3712_v26, 16  ;;  %v3714_v31 = vld [vmem:[%s4093_s30 + $0x14] ss:$0 sps:$4 sm:$0x11]   ;;  %v526_v33 = vshll.u32 %v3713_v17, 16  ;;  %v3719_v51 = vld [vmem:[%s4093_s30 + $0x78] sm:$0xff]  }
  0x2f   : > { %v2329_v22 = vsel %vm510_vm1, %v2324_v14, %v2328_v15  ;;  %v2753_v28 = vsel %vm944_vm0, %v2751_v24, %v2752_v25  ;;  %v624_v29 = vrot.slane %v622_v27, 1  ;;  %v531_v36 = vshll.u32 %v3714_v31, 16  ;;  %v3716_v39 = vld [vmem:[%s4093_s30 + $0x74] ss:$0 sps:$4 sm:$0x11]   ;;  %v3721_v52 = vld [vmem:[%s4093_s30 + $0x78] sm:$0xff]  }
  0x30   : > { %v629_v35 = vrot.slane %v627_v30, 1  ;;  %v528_v38 = vrot.slane %v526_v33, 1  ;;  %v972_v42 = vrot.slane %v3715_v37, 1  ;;  %v973_v44 = vrot.slane %v3716_v39, 1  ;;  %v3717_v45 = vld [vmem:[%s4093_s30 + $0xc] sm:$0xfe]  }
  0x31   : > { %2093 = vrot.lane.b32.xlu1 %v3701_v54, %s4008_s9  ;;  %v625_v34 = vor.u32 %v624_v29, %v620_v13  ;;  %v533_v41 = vrot.slane %v531_v36, 1  ;;  %v3718_v46 = vld [vmem:[%s4093_s30 + $0x14] ss:$0 sps:$4 sm:$0x11]   ;;  %v948_v49 = vrot.slane %v3717_v45, 1  ;;  %v1524_v55 = vshrl.u32 %v3721_v52, 16 }
  0x32   : > { %2077 = vrot.lane.b32.xlu0 %v3702_v59, %s4008_s9  ;;  %v529_v43 = vor.u32 %v528_v38, %v524_v32  ;;  %v974_v48 = vsel %vm944_vm0, %v972_v42, %v973_v44  ;;  %v949_v50 = vrot.slane %v3718_v46, 1  ;;  %v3722_v54 = vld [vmem:[%s4093_s30 + $0x80] ss:$0 sps:$4 sm:$0x11]   ;;  %v1526_v56 = vshll.u32 %v3721_v52, 16  ;;  %v3723_v57 = vld [vmem:[%s4093_s30 + $0x18] sm:$0xff]  }
  0x33   : > { %v630_v40 = vsel %vm510_vm1, %v625_v34, %v629_v35  ;;  %v3720_v58 = vld [vmem:[%s4093_s30 + $0x18] sm:$0xff]   ;;  %v1531_v60 = vshll.u32 %v3722_v54, 16  ;;  %v3724_v61 = vld [vmem:[%s4093_s30 + $0x20] ss:$0 sps:$4 sm:$0x11]   ;;  %v1428_v62 = vshrl.u32 %v3723_v57, 16 }
  0x34   : > { %v534_v47 = vsel %vm510_vm1, %v529_v43, %v533_v41  ;;  %v950_v53 = vsel %vm944_vm0, %v948_v49, %v949_v50  ;;  %v1528_v59 = vrot.slane %v1526_v56, 1  ;;  %v1430_v63 = vshll.u32 %v3723_v57, 16  ;;  %v3725_v3 = vld [vmem:[%s4093_s30 + $0x78] sm:$0xfe]   ;;  %v3731_v17 = vld [vmem:[%s4093_s30 + $0x84] sm:$0xff]  }
  0x35   : > { %2526 = vrot.lane.b32.xlu1 %v2425_v18, %s4009_s10  ;;  %v1533_v1 = vrot.slane %v1531_v60, 1  ;;  %v1435_v2 = vshll.u32 %v3724_v61, 16  ;;  %v3726_v5 = vld [vmem:[%s4093_s30 + $0x80] ss:$0 sps:$4 sm:$0x11]   ;;  %v1875_v8 = vrot.slane %v3725_v3, 1 }
  0x36   : > { %2510 = vrot.lane.b32.xlu0 %v2329_v22, %s4009_s10  ;;  %v1529_v0 = vor.u32 %v1528_v59, %v1524_v55  ;;  %v1432_v4 = vrot.slane %v1430_v63, 1  ;;  %v1876_v10 = vrot.slane %v3726_v5, 1  ;;  %v3727_v11 = vld [vmem:[%s4093_s30 + $0x18] sm:$0xfe]   ;;  %v3729_v18 = vld [vmem:[%s4093_s30 + $0x84] sm:$0xff]   ;;  %v2427_v20 = vshrl.u32 %v3731_v17, 16 }
  0x37   : > { %v1437_v7 = vrot.slane %v1435_v2, 1  ;;  %v3728_v12 = vld [vmem:[%s4093_s30 + $0x20] ss:$0 sps:$4 sm:$0x11]   ;;  %v1851_v15 = vrot.slane %v3727_v11, 1  ;;  %v2429_v21 = vshll.u32 %v3731_v17, 16 }
  0x38   : > { %v1534_v6 = vsel %vm510_vm1, %v1529_v0, %v1533_v1  ;;  %v1433_v9 = vor.u32 %v1432_v4, %v1428_v62  ;;  %v1877_v14 = vsel %vm944_vm0, %v1875_v8, %v1876_v10  ;;  %v1852_v16 = vrot.slane %v3728_v12, 1  ;;  %v3732_v19 = vld [vmem:[%s4093_s30 + $0x8c] ss:$0 sps:$4 sm:$0x11]   ;;  %v3733_v22 = vld [vmem:[%s4093_s30 + $0x24] sm:$0xff]   ;;  %v3739_v34 = vld [vmem:[%s4093_s30 + $0x78] sm:$0xff]  }
  0x39   : > { %2815 = vrot.lane.b32.xlu1 %v2777_v23, %s4010_s11  ;;  %v3730_v24 = vld [vmem:[%s4093_s30 + $0x24] sm:$0xff]   ;;  %v2431_v25 = vrot.slane %v2429_v21, 1  ;;  %v2434_v26 = vshll.u32 %v3732_v19, 16  ;;  %v3734_v27 = vld [vmem:[%s4093_s30 + $0x2c] ss:$0 sps:$4 sm:$0x11]  }
  0x3a   : > { %2799 = vrot.lane.b32.xlu0 %v2753_v28, %s4010_s11  ;;  %v1438_v13 = vsel %vm510_vm1, %v1433_v9, %v1437_v7  ;;  %v1853_v23 = vsel %vm944_vm0, %v1851_v15, %v1852_v16  ;;  %v2331_v28 = vshrl.u32 %v3733_v22, 16  ;;  %v2333_v29 = vshll.u32 %v3733_v22, 16  ;;  %v3735_v33 = vld [vmem:[%s4093_s30 + $0x84] sm:$0xfe]   ;;  %v3743_v62 = vld [vmem:[%s4093_s30 + $0x78] sm:$0xfe]  }
  0x3b   : > { %v2432_v30 = vor.u32 %v2431_v25, %v2427_v20  ;;  %v2436_v31 = vrot.slane %v2434_v26, 1  ;;  %v2338_v32 = vshll.u32 %v3734_v27, 16  ;;  %v3736_v36 = vld [vmem:[%s4093_s30 + $0x8c] ss:$0 sps:$4 sm:$0x11]   ;;  %v2778_v39 = vrot.slane %v3735_v33, 1 }
  0x3c   : > { %v2335_v35 = vrot.slane %v2333_v29, 1  ;;  %v2779_v41 = vrot.slane %v3736_v36, 1  ;;  %v3737_v42 = vld [vmem:[%s4093_s30 + $0x24] sm:$0xfe]   ;;  %v632_v50 = vshrl.u32 %v3739_v34, 16  ;;  %v975_v3 = vrot.slane %v3743_v62, 1 }
  0x3d   : > { %721 = vrot.lane.b32.xlu1 %v630_v40, %s4006_s7  ;;  %v2437_v37 = vsel %vm510_vm1, %v2432_v30, %v2436_v31  ;;  %v2340_v38 = vrot.slane %v2338_v32, 1  ;;  %v3738_v43 = vld [vmem:[%s4093_s30 + $0x2c] ss:$0 sps:$4 sm:$0x11]   ;;  %v2754_v45 = vrot.slane %v3737_v42, 1  ;;  %v3749_v7 = vld [vmem:[%s4093_s30 + $0x84] sm:$0xff]  }
  0x3e   : > { %705 = vrot.lane.b32.xlu0 %v534_v47, %s4006_s7  ;;  %v2336_v40 = vor.u32 %v2335_v35, %v2331_v28  ;;  %v2755_v46 = vrot.slane %v3738_v43, 1  ;;  %v3740_v47 = vld [vmem:[%s4093_s30 + $0x80] ss:$0 sps:$4 sm:$0x11]   ;;  %v2780_v49 = vsel %vm944_vm0, %v2778_v39, %v2779_v41  ;;  %v3745_v5 = vld [vmem:[%s4093_s30 + $0x18] sm:$0xfe]  }
  0x3f   : > { %v639_v52 = vshll.u32 %v3740_v47, 16  ;;  %v3744_v63 = vld [vmem:[%s4093_s30 + $0x80] ss:$0 sps:$4 sm:$0x11]   ;;  %v951_v10 = vrot.slane %v3745_v5, 1  ;;  %v3751_v11 = vld [vmem:[%s4093_s30 + $0x24] sm:$0xff]  }
  0x40   : > { %v2341_v44 = vsel %vm510_vm1, %v2336_v40, %v2340_v38  ;;  %v2756_v57 = vsel %vm944_vm0, %v2754_v45, %v2755_v46  ;;  %v976_v4 = vrot.slane %v3744_v63, 1  ;;  %v1538_v15 = vshll.u32 %v3749_v7, 16  ;;  %v3748_v21 = vld [vmem:[%s4093_s30 + $0x24] sm:$0xff]   ;;  %v3754_v30 = vld [vmem:[%s4093_s30 + $0x8c] ss:$0 sps:$4 sm:$0x11]  }
  0x41   : > { %1011 = vrot.lane.b32.xlu1 %v974_v48, %s4005_s6  ;;  %v3741_v48 = vld [vmem:[%s4093_s30 + $0x18] sm:$0xff]   ;;  %v1440_v16 = vshrl.u32 %v3751_v11, 16  ;;  %v1442_v19 = vshll.u32 %v3751_v11, 16  ;;  %v3753_v29 = vld [vmem:[%s4093_s30 + $0x84] sm:$0xfe]   ;;  %v3759_v31 = vld [vmem:[%s4093_s30 + $0x90] sm:$0xff]  }
  0x42   : > { %995 = vrot.lane.b32.xlu0 %v950_v53, %s4005_s6  ;;  %v3742_v53 = vld [vmem:[%s4093_s30 + $0x20] ss:$0 sps:$4 sm:$0x11]   ;;  %v536_v55 = vshrl.u32 %v3741_v48, 16  ;;  %v538_v56 = vshll.u32 %v3741_v48, 16  ;;  %v977_v9 = vsel %vm944_vm0, %v975_v3, %v976_v4  ;;  %v1540_v20 = vrot.slane %v1538_v15, 1 }
  0x43   : > { %v543_v59 = vshll.u32 %v3742_v53, 16  ;;  %v3755_v35 = vld [vmem:[%s4093_s30 + $0x24] sm:$0xfe]   ;;  %v1879_v36 = vrot.slane %v3754_v30, 1  ;;  %v2439_v40 = vshrl.u32 %v3759_v31, 16  ;;  %v2441_v43 = vshll.u32 %v3759_v31, 16 }
  0x44   : > { %v540_v61 = vrot.slane %v538_v56, 1  ;;  %v1854_v39 = vrot.slane %v3755_v35, 1  ;;  %v3760_v45 = vld [vmem:[%s4093_s30 + $0x98] ss:$0 sps:$4 sm:$0x11]   ;;  %v3761_v48 = vld [vmem:[%s4093_s30 + $0x30] sm:$0xff]  }
  0x45   : > { %1192 = vrot.lane.b32.xlu1 %v3719_v51, %s4003_s4  ;;  %v634_v51 = vshll.u32 %v3739_v34, 16  ;;  %v545_v0 = vrot.slane %v543_v59, 1  ;;  %v1878_v34 = vrot.slane %v3753_v29, 1  ;;  %v2443_v46 = vrot.slane %v2441_v43, 1  ;;  %v3767_v56 = vld [vmem:[%s4093_s30 + $0x84] sm:$0xff]  }
  0x46   : > { %1176 = vrot.lane.b32.xlu0 %v3720_v58, %s4003_s4  ;;  %v641_v58 = vrot.slane %v639_v52, 1  ;;  %v541_v2 = vor.u32 %v540_v61, %v536_v55  ;;  %v2446_v52 = vshll.u32 %v3760_v45, 16  ;;  %v2343_v53 = vshrl.u32 %v3761_v48, 16  ;;  %v3764_v59 = vld [vmem:[%s4093_s30 + $0x98] ss:$0 sps:$4 sm:$0x11]  }
  0x47   : > { %v636_v54 = vrot.slane %v634_v51, 1  ;;  %v1880_v41 = vsel %vm944_vm0, %v1878_v34, %v1879_v36  ;;  %v2444_v51 = vor.u32 %v2443_v46, %v2439_v40  ;;  %v3769_v62 = vld [vmem:[%s4093_s30 + $0x24] sm:$0xff]   ;;  %v3766_v4 = vld [vmem:[%s4093_s30 + $0x38] ss:$0 sps:$4 sm:$0x11]   ;;  %v644_v5 = vshrl.u32 %v3767_v56, 16 }
  0x48   : > { %v546_v8 = vsel %vm510_vm1, %v541_v2, %v545_v0  ;;  %v3765_v2 = vld [vmem:[%s4093_s30 + $0x30] sm:$0xfe]   ;;  %v548_v15 = vshrl.u32 %v3769_v62, 16  ;;  %v3773_v30 = vld [vmem:[%s4093_s30 + $0x24] sm:$0xfe]  }
  0x49   : > { %1625 = vrot.lane.b32.xlu1 %v1534_v6, %s4007_s8  ;;  %v637_v60 = vor.u32 %v636_v54, %v632_v50  ;;  %v3746_v6 = vld [vmem:[%s4093_s30 + $0x20] ss:$0 sps:$4 sm:$0x11]   ;;  %v3758_v50 = vld [vmem:[%s4093_s30 + $0x30] sm:$0xff]   ;;  %v2345_v54 = vshll.u32 %v3761_v48, 16  ;;  %v954_v34 = vrot.slane %v3773_v30, 1 }
  0x4a   : > { %1609 = vrot.lane.b32.xlu0 %v1438_v13, %s4007_s8  ;;  %v952_v12 = vrot.slane %v3746_v6, 1  ;;  %v3747_v13 = vld [vmem:[%s4093_s30 + $0x84] sm:$0xff]   ;;  %v2757_v6 = vrot.slane %v3765_v2, 1  ;;  %v3774_v31 = vld [vmem:[%s4093_s30 + $0x2c] ss:$0 sps:$4 sm:$0x11]  }
  0x4b   : > { %v642_v1 = vsel %vm510_vm1, %v637_v60, %v641_v58  ;;  %v3763_v58 = vld [vmem:[%s4093_s30 + $0x90] sm:$0xfe]   ;;  %v2347_v60 = vrot.slane %v2345_v54, 1  ;;  %v955_v35 = vrot.slane %v3774_v31, 1  ;;  %v3787_v54 = vld [vmem:[%s4093_s30 + $0x9c] sm:$0xff]  }
  0x4c   : > { %v953_v17 = vsel %vm944_vm0, %v951_v10, %v952_v12  ;;  %v2781_v0 = vrot.slane %v3763_v58, 1  ;;  %v3768_v10 = vld [vmem:[%s4093_s30 + $0x8c] ss:$0 sps:$4 sm:$0x11]   ;;  %v3776_v48 = vld [vmem:[%s4093_s30 + $0x30] sm:$0xff]   ;;  %v2451_v2 = vshrl.u32 %v3787_v54, 16 }
  0x4d   : > { %1914 = vrot.lane.b32.xlu1 %v1877_v14, %s4004_s5  ;;  %v1536_v14 = vshrl.u32 %v3749_v7, 16  ;;  %v2348_v3 = vor.u32 %v2347_v60, %v2343_v53  ;;  %v646_v7 = vshll.u32 %v3767_v56, 16  ;;  %v956_v40 = vsel %vm944_vm0, %v954_v34, %v955_v35  ;;  %v3782_v53 = vld [vmem:[%s4093_s30 + $0x98] ss:$0 sps:$4 sm:$0x11]   ;;  %v3797_v30 = vld [vmem:[%s4093_s30 + $0x90] sm:$0xff]  }
  0x4e   : > { %1898 = vrot.lane.b32.xlu0 %v1853_v23, %s4004_s5  ;;  %v3752_v23 = vld [vmem:[%s4093_s30 + $0x2c] ss:$0 sps:$4 sm:$0x11]   ;;  %v3783_v60 = vld [vmem:[%s4093_s30 + $0x30] sm:$0xfe]  }
  0x4f   : > { %v1541_v25 = vor.u32 %v1540_v20, %v1536_v14  ;;  %v1447_v28 = vshll.u32 %v3752_v23, 16  ;;  %v648_v12 = vrot.slane %v646_v7, 1  ;;  %v3770_v14 = vld [vmem:[%s4093_s30 + $0x2c] ss:$0 sps:$4 sm:$0x11]  }
  0x50   : > { %v3772_v23 = vld [vmem:[%s4093_s30 + $0x8c] ss:$0 sps:$4 sm:$0x11]  }
  0x51   : > { %2095 = vrot.lane.b32.xlu1 %v3729_v18, %s4008_s9  ;;  %v3750_v18 = vld [vmem:[%s4093_s30 + $0x8c] ss:$0 sps:$4 sm:$0x11]   ;;  %v1449_v33 = vrot.slane %v1447_v28, 1  ;;  %v979_v29 = vrot.slane %v3772_v23, 1 }
  0x52   : > { %2079 = vrot.lane.b32.xlu0 %v3730_v24, %s4008_s9  ;;  %v1543_v22 = vshll.u32 %v3750_v18, 16  ;;  %v1444_v24 = vrot.slane %v1442_v19, 1 }
  0x54   : > { %v1545_v26 = vrot.slane %v1543_v22, 1  ;;  %v1445_v27 = vor.u32 %v1444_v24, %v1440_v16  ;;  %v550_v16 = vshll.u32 %v3769_v62, 16  ;;  %v3771_v22 = vld [vmem:[%s4093_s30 + $0x84] sm:$0xfe]   ;;  %v3777_v24 = vld [vmem:[%s4093_s30 + $0x90] sm:$0xff]  }
  0x55   : > { %2528 = vrot.lane.b32.xlu1 %v2437_v37, %s4009_s10  ;;  %v3756_v37 = vld [vmem:[%s4093_s30 + $0x2c] ss:$0 sps:$4 sm:$0x11]   ;;  %v978_v28 = vrot.slane %v3771_v22, 1  ;;  %v1548_v36 = vshrl.u32 %v3777_v24, 16 }
  0x56   : > { %2512 = vrot.lane.b32.xlu0 %v2341_v44, %s4009_s10  ;;  %v1546_v32 = vsel %vm510_vm1, %v1541_v25, %v1545_v26  ;;  %v1450_v38 = vsel %vm510_vm1, %v1445_v27, %v1449_v33  ;;  %v1855_v42 = vrot.slane %v3756_v37, 1  ;;  %v3757_v44 = vld [vmem:[%s4093_s30 + $0x90] sm:$0xff]   ;;  %v552_v20 = vrot.slane %v550_v16, 1  ;;  %v3792_v22 = vld [vmem:[%s4093_s30 + $0x9c] sm:$0xfe]  }
  0x57   : > { %v980_v33 = vsel %vm944_vm0, %v978_v28, %v979_v29  ;;  %v1550_v37 = vshll.u32 %v3777_v24, 16  ;;  %v2784_v29 = vrot.slane %v3792_v22, 1  ;;  %v3815_v22 = vld [vmem:[%s4093_s30 + $0x6c] sm:$0xff]  }
  0x58   : > { %v1856_v47 = vsel %vm944_vm0, %v1854_v39, %v1855_v42  ;;  %v553_v26 = vor.u32 %v552_v20, %v548_v15  ;;  %v3779_v39 = vld [vmem:[%s4093_s30 + $0x30] sm:$0xff]   ;;  %v3786_v15 = vld [vmem:[%s4093_s30 + $0x3c] sm:$0xff]   ;;  %327 = vst.msk [vmem:[#allocation2 + $0x48] sm:$0xff] %vm317_vm2, %v3815_v22 }
  0x59   : > { %2817 = vrot.lane.b32.xlu1 %v2780_v49, %s4010_s11  ;;  %v3762_v49 = vld [vmem:[%s4093_s30 + $0x38] ss:$0 sps:$4 sm:$0x11]   ;;  %v1552_v42 = vrot.slane %v1550_v37, 1  ;;  %v1452_v45 = vshrl.u32 %v3779_v39, 16  ;;  %v1454_v46 = vshll.u32 %v3779_v39, 16 }
  0x5a   : > { %2801 = vrot.lane.b32.xlu0 %v2756_v57, %s4010_s11  ;;  %v2350_v55 = vshll.u32 %v3762_v49, 16  ;;  %v2448_v57 = vrot.slane %v2446_v52, 1  ;;  %v3781_v52 = vld [vmem:[%s4093_s30 + $0x90] sm:$0xfe]  }
  0x5b   : > { %v1881_v58 = vrot.slane %v3781_v52, 1  ;;  %v3798_v39 = vld [vmem:[%s4093_s30 + $0x98] ss:$0 sps:$4 sm:$0x11]  }
  0x5c   : > { %v2352_v61 = vrot.slane %v2350_v55, 1  ;;  %v2449_v63 = vsel %vm510_vm1, %v2444_v51, %v2448_v57 }
  0x5d   : > { %723 = vrot.lane.b32.xlu1 %v642_v1, %s4006_s7  ;;  %v2782_v1 = vrot.slane %v3764_v59, 1  ;;  %v1882_v59 = vrot.slane %v3782_v53, 1 }
  0x5e   : > { %707 = vrot.lane.b32.xlu0 %v546_v8, %s4006_s7  ;;  %v2353_v8 = vsel %vm510_vm1, %v2348_v3, %v2352_v61  ;;  %v3784_v61 = vld [vmem:[%s4093_s30 + $0x38] ss:$0 sps:$4 sm:$0x11]   ;;  %v2453_v3 = vshll.u32 %v3787_v54, 16 }
  0x5f   : > { %v2783_v11 = vsel %vm944_vm0, %v2781_v0, %v2782_v1  ;;  %v1858_v0 = vrot.slane %v3784_v61, 1  ;;  %v1883_v1 = vsel %vm944_vm0, %v1881_v58, %v1882_v59 }
  0x61   : > { %1013 = vrot.lane.b32.xlu1 %v977_v9, %s4005_s6  ;;  %v2758_v9 = vrot.slane %v3766_v4, 1  ;;  %v3788_v4 = vld [vmem:[%s4093_s30 + $0xa4] ss:$0 sps:$4 sm:$0x11]  }
  0x62   : > { %997 = vrot.lane.b32.xlu0 %v953_v17, %s4005_s6  ;;  %v649_v17 = vor.u32 %v648_v12, %v644_v5  ;;  %v3789_v5 = vld [vmem:[%s4093_s30 + $0x3c] sm:$0xff]   ;;  %v3790_v12 = vld [vmem:[%s4093_s30 + $0x44] ss:$0 sps:$4 sm:$0x11]  }
  0x63   : > { %v2759_v18 = vsel %vm944_vm0, %v2757_v6, %v2758_v9  ;;  %v2455_v9 = vrot.slane %v2453_v3, 1  ;;  %v2362_v20 = vshll.u32 %v3790_v12, 16  ;;  %v3808_v12 = vld [vmem:[%s4093_s30 + $0xa4] ss:$0 sps:$4 sm:$0x11]  }
  0x65   : > { %1194 = vrot.lane.b32.xlu1 %v3747_v13, %s4003_s4  ;;  %v651_v13 = vshll.u32 %v3768_v10, 16  ;;  %v2456_v16 = vor.u32 %v2455_v9, %v2451_v2  ;;  %v2364_v24 = vrot.slane %v2362_v20, 1  ;;  %v3807_v9 = vld [vmem:[%s4093_s30 + $0x9c] sm:$0xff]  }
  0x66   : > { %1178 = vrot.lane.b32.xlu0 %v3748_v21, %s4003_s4  ;;  %v555_v21 = vshll.u32 %v3770_v14, 16  ;;  %v2357_v14 = vshll.u32 %v3789_v5, 16 }
  0x67   : > { %v653_v19 = vrot.slane %v651_v13, 1  ;;  %v2355_v13 = vshrl.u32 %v3789_v5, 16 }
  0x68   : > { %v557_v27 = vrot.slane %v555_v21, 1  ;;  %v3796_v21 = vld [vmem:[%s4093_s30 + $0x60] sm:$0xff]  }
  0x69   : > { %1627 = vrot.lane.b32.xlu1 %v1546_v32, %s4007_s8  ;;  %v654_v25 = vsel %vm510_vm1, %v649_v17, %v653_v19  ;;  %v3791_v17 = vld [vmem:[%s4093_s30] sm:$0xff]   ;;  %v2359_v19 = vrot.slane %v2357_v14, 1  ;;  %326 = vst.msk [vmem:[#allocation2 + $0x40] sm:$0xff] %vm317_vm2, %v3796_v21  ;;  %v1560_v14 = vshrl.u32 %v3807_v9, 16 }
  0x6a   : > { %1611 = vrot.lane.b32.xlu0 %v1450_v38, %s4007_s8  ;;  %v558_v32 = vsel %vm510_vm1, %v553_v26, %v557_v27  ;;  %v3778_v38 = vld [vmem:[%s4093_s30 + $0x98] ss:$0 sps:$4 sm:$0x11]   ;;  %318 = vst.msk [vmem:[#allocation2] sm:$0xff] %vm317_vm2, %v3791_v17 }
  0x6b   : > { %v1555_v43 = vshll.u32 %v3778_v38, 16  ;;  %v2360_v23 = vor.u32 %v2359_v19, %v2355_v13  ;;  %v3810_v17 = vld [vmem:[%s4093_s30 + $0x44] ss:$0 sps:$4 sm:$0x11]  }
  0x6d   : > { %1916 = vrot.lane.b32.xlu1 %v1880_v41, %s4004_s5  ;;  %v3775_v41 = vld [vmem:[%s4093_s30 + $0x90] sm:$0xff]   ;;  %v1557_v49 = vrot.slane %v1555_v43, 1  ;;  %v2365_v34 = vsel %vm510_vm1, %v2360_v23, %v2364_v24 }
  0x6e   : > { %1900 = vrot.lane.b32.xlu0 %v1856_v47, %s4004_s5  ;;  %v1553_v47 = vor.u32 %v1552_v42, %v1548_v36  ;;  %v3799_v42 = vld [vmem:[%s4093_s30 + $0x30] sm:$0xff]  }
  0x70   : > { %v1558_v55 = vsel %vm510_vm1, %v1553_v47, %v1557_v49  ;;  %v562_v49 = vshll.u32 %v3799_v42, 16 }
  0x71   : > { %2097 = vrot.lane.b32.xlu1 %v3757_v44, %s4008_s9  ;;  %v3780_v44 = vld [vmem:[%s4093_s30 + $0x38] ss:$0 sps:$4 sm:$0x11]  }
  0x72   : > { %2081 = vrot.lane.b32.xlu0 %v3758_v50, %s4008_s9  ;;  %v1456_v50 = vrot.slane %v1454_v46, 1  ;;  %v1459_v51 = vshll.u32 %v3780_v44, 16  ;;  %v3800_v46 = vld [vmem:[%s4093_s30 + $0x38] ss:$0 sps:$4 sm:$0x11]   ;;  %v564_v54 = vrot.slane %v562_v49, 1 }
  0x73   : > { %v567_v53 = vshll.u32 %v3800_v46, 16  ;;  %v3821_v46 = vld [vmem:[%s4093_s30 + $0x48] sm:$0xff]  }
  0x74   : > { %v1457_v56 = vor.u32 %v1456_v50, %v1452_v45  ;;  %v1461_v57 = vrot.slane %v1459_v51, 1  ;;  %v663_v45 = vshll.u32 %v3798_v39, 16  ;;  %v3814_v39 = vld [vmem:[%s4093_s30 + $0x44] ss:$0 sps:$4 sm:$0x11]   ;;  %v3818_v49 = vld [vmem:[%s4093_s30 + $0x48] sm:$0xff]  }
  0x75   : > { %2530 = vrot.lane.b32.xlu1 %v2449_v63, %s4009_s10  ;;  %v1857_v63 = vrot.slane %v3783_v60, 1  ;;  %v569_v58 = vrot.slane %v567_v53, 1 }
  0x76   : > { %2514 = vrot.lane.b32.xlu0 %v2353_v8, %s4009_s10  ;;  %v1462_v62 = vsel %vm510_vm1, %v1457_v56, %v1461_v57  ;;  %v3785_v8 = vld [vmem:[%s4093_s30 + $0x9c] sm:$0xff]   ;;  %v665_v52 = vrot.slane %v663_v45, 1  ;;  %v3802_v56 = vld [vmem:[%s4093_s30 + $0x98] ss:$0 sps:$4 sm:$0x11]   ;;  %v3817_v45 = vld [vmem:[%s4093_s30 + $0xa8] sm:$0xff]  }
  0x77   : > { %v1859_v10 = vsel %vm944_vm0, %v1857_v63, %v1858_v0  ;;  %v3803_v63 = vld [vmem:[%s4093_s30 + $0x30] sm:$0xfe]   ;;  %v3804_v0 = vld [vmem:[%s4093_s30 + $0x38] ss:$0 sps:$4 sm:$0x11]  }
  0x78   : > { %v958_v5 = vrot.slane %v3804_v0, 1 }
  0x79   : > { %2819 = vrot.lane.b32.xlu1 %v2783_v11, %s4010_s11  ;;  %v2458_v11 = vshll.u32 %v3788_v4, 16  ;;  %v957_v4 = vrot.slane %v3803_v63, 1 }
  0x7a   : > { %2803 = vrot.lane.b32.xlu0 %v2759_v18, %s4010_s11 }
  0x7b   : > { %v2460_v18 = vrot.slane %v2458_v11, 1  ;;  %v3806_v11 = vld [vmem:[%s4093_s30 + $0x3c] sm:$0xff]  }
  0x7d   : > { %725 = vrot.lane.b32.xlu1 %v654_v25, %s4006_s7  ;;  %v3793_v25 = vld [vmem:[%s4093_s30 + $0xa4] ss:$0 sps:$4 sm:$0x11]   ;;  %v2461_v28 = vsel %vm510_vm1, %v2456_v16, %v2460_v18  ;;  %v1567_v16 = vshll.u32 %v3808_v12, 16 }
  0x7e   : > { %709 = vrot.lane.b32.xlu0 %v558_v32, %s4006_s7  ;;  %v2785_v31 = vrot.slane %v3793_v25, 1  ;;  %v3794_v32 = vld [vmem:[%s4093_s30 + $0x3c] sm:$0xfe]   ;;  %v1471_v25 = vshll.u32 %v3810_v17, 16 }
  0x7f   : > { %v2760_v35 = vrot.slane %v3794_v32, 1  ;;  %v1569_v23 = vrot.slane %v1567_v16, 1  ;;  %v3826_v17 = vld [vmem:[%s4093_s30 + $0x50] ss:$0 sps:$4 sm:$0x11]  }
  0x80   : > { %v2786_v38 = vsel %vm944_vm0, %v2784_v29, %v2785_v31  ;;  %v3811_v29 = vld [vmem:[%s4093_s30 + $0x9c] sm:$0xfe]   ;;  %v1473_v32 = vrot.slane %v1471_v25, 1  ;;  %v2764_v22 = vrot.slane %v3826_v17, 1 }
  0x81   : > { %1015 = vrot.lane.b32.xlu1 %v980_v33, %s4005_s6  ;;  %v3795_v33 = vld [vmem:[%s4093_s30 + $0x44] ss:$0 sps:$4 sm:$0x11]  }
  0x82   : > { %999 = vrot.lane.b32.xlu0 %v956_v40, %s4005_s6  ;;  %v2761_v36 = vrot.slane %v3795_v33, 1  ;;  %v656_v40 = vshrl.u32 %v3797_v30, 16 }
  0x84   : > { %v2762_v47 = vsel %vm944_vm0, %v2760_v35, %v2761_v36  ;;  %v1884_v35 = vrot.slane %v3811_v29, 1  ;;  %v3830_v29 = vld [vmem:[%s4093_s30 + $0x44] ss:$0 sps:$4 sm:$0x11]  }
  0x85   : > { %1196 = vrot.lane.b32.xlu1 %v3775_v41, %s4003_s4  ;;  %v658_v41 = vshll.u32 %v3797_v30, 16  ;;  %v3812_v30 = vld [vmem:[%s4093_s30 + $0xa4] ss:$0 sps:$4 sm:$0x11]  }
  0x86   : > { %1180 = vrot.lane.b32.xlu0 %v3776_v48, %s4003_s4  ;;  %v560_v48 = vshrl.u32 %v3799_v42, 16  ;;  %v1885_v36 = vrot.slane %v3812_v30, 1 }
  0x87   : > { %v660_v44 = vrot.slane %v658_v41, 1 }
  0x88   : > { %v565_v60 = vor.u32 %v564_v54, %v560_v48  ;;  %v1886_v41 = vsel %vm944_vm0, %v1884_v35, %v1885_v36  ;;  %v2367_v54 = vshrl.u32 %v3821_v46, 16  ;;  %v579_v35 = vshll.u32 %v3830_v29, 16  ;;  %v3831_v36 = vld [vmem:[%s4093_s30 + $0x9c] sm:$0xfe]   ;;  %v3848_v29 = vld [vmem:[%s4093_s30 + $0x54] sm:$0xff]  }
  0x89   : > { %1629 = vrot.lane.b32.xlu1 %v1558_v55, %s4007_s8  ;;  %v661_v51 = vor.u32 %v660_v44, %v656_v40  ;;  %v3801_v55 = vld [vmem:[%s4093_s30 + $0x90] sm:$0xfe]   ;;  %v1861_v44 = vrot.slane %v3814_v39, 1  ;;  %v3837_v39 = vld [vmem:[%s4093_s30 + $0xa8] sm:$0xff]  }
  0x8a   : > { %1613 = vrot.lane.b32.xlu0 %v1462_v62, %s4007_s8  ;;  %v981_v61 = vrot.slane %v3801_v55, 1  ;;  %v982_v62 = vrot.slane %v3802_v56, 1 }
  0x8b   : > { %v666_v57 = vsel %vm510_vm1, %v661_v51, %v665_v52  ;;  %v3820_v51 = vld [vmem:[%s4093_s30 + $0xb0] ss:$0 sps:$4 sm:$0x11]  }
  0x8c   : > { %v983_v3 = vsel %vm944_vm0, %v981_v61, %v982_v62  ;;  %v2470_v56 = vshll.u32 %v3820_v51, 16 }
  0x8d   : > { %1918 = vrot.lane.b32.xlu1 %v1883_v1, %s4004_s5  ;;  %v570_v1 = vsel %vm510_vm1, %v565_v60, %v569_v58  ;;  %v2369_v58 = vshll.u32 %v3821_v46, 16  ;;  %v3833_v46 = vld [vmem:[%s4093_s30 + $0x3c] sm:$0xfe]  }
  0x8e   : > { %v4299_v6 = vpop.permute.xlu1 %1190  ;;  %1902 = vrot.lane.b32.xlu0 %v1859_v10, %s4004_s5  ;;  %v959_v10 = vsel %vm944_vm0, %v957_v4, %v958_v5  ;;  %v2472_v63 = vrot.slane %v2470_v56, 1  ;;  %v3827_v4 = vld [vmem:[%s4093_s30 + $0x9c] sm:$0xff]   ;;  %v960_v51 = vrot.slane %v3833_v46, 1  ;;  %v1574_v56 = vshll.u32 %v3837_v39, 16 }
  0x8f   : > { %v1175_v7 = vpop.permute.xlu0 %1174  ;;  %v2371_v0 = vrot.slane %v2369_v58, 1  ;;  %v3836_v58 = vld [vmem:[%s4093_s30 + $0x48] sm:$0xff]   ;;  %v3854_v46 = vld [vmem:[%s4093_s30 + $0xbc] ss:$0 sps:$4 sm:$0x11]  }
  0x91   : > { %2099 = vrot.lane.b32.xlu1 %v3785_v8, %s4008_s9 }
  0x92   : > { %2083 = vrot.lane.b32.xlu0 %v3786_v15, %s4008_s9  ;;  %v1562_v15 = vshll.u32 %v3807_v9, 16 }
  0x93   : > { %v4314_v26 = vpop.permute.xlu0 %1896  ;;  %v994_v27 = vpop.permute.xlu1 %993 }
  0x94   : > { %v1564_v21 = vrot.slane %v1562_v15, 1 }
  0x95   : > { %2532 = vrot.lane.b32.xlu1 %v2461_v28, %s4009_s10 }
  0x96   : > { %2516 = vrot.lane.b32.xlu0 %v2365_v34, %s4009_s10  ;;  %v1565_v28 = vor.u32 %v1564_v21, %v1560_v14  ;;  %v3825_v14 = vld [vmem:[%s4093_s30 + $0x48] sm:$0xfe]   ;;  %v670_v21 = vshll.u32 %v3827_v4, 16 }
  0x97   : > { %v1010_v37 = vpop.permute.xlu1 %1009 }
  0x98   : > { %v704_v43 = vpop.permute.xlu0 %703  ;;  %v1570_v34 = vsel %vm510_vm1, %v1565_v28, %v1569_v23  ;;  %v3828_v23 = vld [vmem:[%s4093_s30 + $0xa4] ss:$0 sps:$4 sm:$0x11]   ;;  %v672_v25 = vrot.slane %v670_v21, 1 }
  0x99   : > { %752 = vst.msk [vmem:[#allocation2] sm:$0xff] %vm751_vm3, %v704_v43  ;;  %2821 = vrot.lane.b32.xlu1 %v2786_v38, %s4010_s11  ;;  %v3819_v43 = vld [vmem:[%s4093_s30 + $0xa8] sm:$0xff]   ;;  %v675_v28 = vshll.u32 %v3828_v23, 16 }
  0x9a   : > { %1042 = vst.msk [vmem:[#allocation2] sm:$0xff] %vm1041_vm4, %v994_v27  ;;  %2805 = vrot.lane.b32.xlu0 %v2762_v47, %s4010_s11  ;;  %v2463_v52 = vshrl.u32 %v3819_v43, 16  ;;  %v2465_v53 = vshll.u32 %v3819_v43, 16 }
  0x9b   : > { %v1913_v50 = vpop.permute.xlu1 %1912  ;;  %1223 = vst.msk [vmem:[#allocation2] sm:$0xff] %vm1222_vm5, %v1175_v7  ;;  %v3805_v7 = vld [vmem:[%s4093_s30 + $0x9c] sm:$0xff]  }
  0x9c   : > { %v720_v59 = vpop.permute.xlu0 %719  ;;  %v2467_v55 = vrot.slane %v2465_v53, 1  ;;  %v3835_v53 = vld [vmem:[%s4093_s30 + $0xa8] sm:$0xff]  }
  0x9d   : > { %727 = vrot.lane.b32.xlu1 %v666_v57, %s4006_s7  ;;  %760 = vst.msk [vmem:[#allocation2 + $0x40] sm:$0xff] %vm751_vm3, %v720_v59  ;;  %v3822_v57 = vld [vmem:[%s4093_s30 + $0x50] ss:$0 sps:$4 sm:$0x11]  }
  0x9e   : > { %1050 = vst.msk [vmem:[#allocation2 + $0x40] sm:$0xff] %vm1041_vm4, %v1010_v37  ;;  %711 = vrot.lane.b32.xlu0 %v570_v1, %s4006_s7  ;;  %v3813_v37 = vld [vmem:[%s4093_s30 + $0x3c] sm:$0xfe]   ;;  %v2468_v62 = vor.u32 %v2467_v55, %v2463_v52  ;;  %v2374_v1 = vshll.u32 %v3822_v57, 16  ;;  %v1572_v55 = vshrl.u32 %v3837_v39, 16 }
  0x9f   : > { %v1624_v2 = vpop.permute.xlu1 %1623  ;;  %1231 = vst.msk [vmem:[#allocation2 + $0x40] sm:$0xff] %vm1222_vm5, %v4299_v6  ;;  %v3809_v6 = vld [vmem:[%s4093_s30 + $0x3c] sm:$0xff]   ;;  %v1860_v42 = vrot.slane %v3813_v37, 1 }
  0xa0   : > { %1664 = vst.msk [vmem:[#allocation2 + $0x40] sm:$0xff] %vm1655_vm6, %v1624_v2  ;;  %v1608_v8 = vpop.permute.xlu0 %1607  ;;  %v1464_v18 = vshrl.u32 %v3809_v6, 16  ;;  %v1466_v19 = vshll.u32 %v3809_v6, 16  ;;  %v3823_v2 = vld [vmem:[%s4093_s30 + $0xa8] sm:$0xfe]   ;;  %v2473_v5 = vsel %vm510_vm1, %v2468_v62, %v2472_v63  ;;  %v3845_v62 = vld [vmem:[%s4093_s30 + $0x78] sm:$0xff]  }
  0xa1   : > { %1017 = vrot.lane.b32.xlu1 %v983_v3, %s4005_s6  ;;  %1656 = vst.msk [vmem:[#allocation2] sm:$0xff] %vm1655_vm6, %v1608_v8  ;;  %v1862_v48 = vsel %vm944_vm0, %v1860_v42, %v1861_v44  ;;  %v3824_v3 = vld [vmem:[%s4093_s30 + $0xb0] ss:$0 sps:$4 sm:$0x11]   ;;  %v2376_v8 = vrot.slane %v2374_v1, 1  ;;  %v581_v42 = vrot.slane %v579_v35, 1 }
  0xa2   : > { %1953 = vst.msk [vmem:[#allocation2 + $0x40] sm:$0xff] %vm1944_vm7, %v1913_v50  ;;  %1945 = vst.msk [vmem:[#allocation2] sm:$0xff] %vm1944_vm7, %v4314_v26  ;;  %1001 = vrot.lane.b32.xlu0 %v959_v10, %s4005_s6  ;;  %v1468_v24 = vrot.slane %v1466_v19, 1  ;;  %v3816_v26 = vld [vmem:[%s4093_s30 + $0xc] sm:$0xff]   ;;  %v2787_v10 = vrot.slane %v3823_v2, 1  ;;  %v984_v44 = vrot.slane %v3831_v36, 1 }
  0xa3   : > { %v2094_v13 = vpop.permute.xlu1 %2093  ;;  %319 = vst.msk [vmem:[#allocation2 + $0x8] sm:$0xff] %vm317_vm2, %v3816_v26  ;;  %v3840_v1 = vld [vmem:[%s4093_s30 + $0x50] ss:$0 sps:$4 sm:$0x11]   ;;  %328 = vst.msk [vmem:[#allocation2 + $0x50] sm:$0xff] %vm317_vm2, %v3845_v62  ;;  %v3851_v36 = vld [vmem:[%s4093_s30 + $0x54] sm:$0xff]  }
  0xa4   : > { %2134 = vst.msk [vmem:[#allocation2 + $0x40] sm:$0xff] %vm2125_vm8, %v2094_v13  ;;  %v2078_v20 = vpop.permute.xlu0 %2077  ;;  %v1469_v31 = vor.u32 %v1468_v24, %v1464_v18  ;;  %v2788_v13 = vrot.slane %v3824_v3, 1  ;;  %v668_v18 = vshrl.u32 %v3827_v4, 16  ;;  %v3852_v39 = vld [vmem:[%s4093_s30 + $0x5c] ss:$0 sps:$4 sm:$0x11]  }
  0xa5   : > { %1198 = vrot.lane.b32.xlu1 %v3805_v7, %s4003_s4  ;;  %2126 = vst.msk [vmem:[#allocation2] sm:$0xff] %vm2125_vm8, %v2078_v20  ;;  %v2372_v7 = vor.u32 %v2371_v0, %v2367_v54  ;;  %v2763_v20 = vrot.slane %v3825_v14, 1 }
  0xa6   : > { %1182 = vrot.lane.b32.xlu0 %v3806_v11, %s4003_s4  ;;  %v1474_v38 = vsel %vm510_vm1, %v1469_v31, %v1473_v32  ;;  %v3829_v11 = vld [vmem:[%s4093_s30 + $0x3c] sm:$0xff]   ;;  %v2789_v19 = vsel %vm944_vm0, %v2787_v10, %v2788_v13  ;;  %v673_v32 = vor.u32 %v672_v25, %v668_v18  ;;  %v3841_v10 = vld [vmem:[%s4093_s30 + $0xa8] sm:$0xfe]  }
  0xa7   : > { %v2527_v27 = vpop.permute.xlu1 %2526  ;;  %v2377_v15 = vsel %vm510_vm1, %v2372_v7, %v2376_v8  ;;  %v2765_v26 = vsel %vm944_vm0, %v2763_v20, %v2764_v22  ;;  %v572_v30 = vshrl.u32 %v3829_v11, 16  ;;  %v574_v31 = vshll.u32 %v3829_v11, 16  ;;  %v3846_v11 = vld [vmem:[%s4093_s30 + $0x18] sm:$0xff]   ;;  %v3844_v20 = vld [vmem:[%s4093_s30 + $0x50] ss:$0 sps:$4 sm:$0x11]  }
  0xa8   : > { %2567 = vst.msk [vmem:[#allocation2 + $0x40] sm:$0xff] %vm2558_vm9, %v2527_v27  ;;  %v2511_v33 = vpop.permute.xlu0 %2510 }
  0xa9   : > { %2559 = vst.msk [vmem:[#allocation2] sm:$0xff] %vm2558_vm9, %v2511_v33  ;;  %1631 = vrot.lane.b32.xlu1 %v1570_v34, %s4007_s8  ;;  %v677_v33 = vrot.slane %v675_v28, 1  ;;  %v576_v34 = vrot.slane %v574_v31, 1  ;;  %v3847_v28 = vld [vmem:[%s4093_s30 + $0xb4] sm:$0xff]  }
  0xaa   : > { %1615 = vrot.lane.b32.xlu0 %v1474_v38, %s4007_s8  ;;  %v3832_v38 = vld [vmem:[%s4093_s30 + $0xa4] ss:$0 sps:$4 sm:$0x11]   ;;  %320 = vst.msk [vmem:[#allocation2 + $0x10] sm:$0xff] %vm317_vm2, %v3846_v11 }
  0xab   : > { %v2816_v40 = vpop.permute.xlu1 %2815  ;;  %v3850_v31 = vld [vmem:[%s4093_s30 + $0xbc] ss:$0 sps:$4 sm:$0x11]  }
  0xac   : > { %2856 = vst.msk [vmem:[#allocation2 + $0x40] sm:$0xff] %vm2847_vm10, %v2816_v40  ;;  %v2800_v47 = vpop.permute.xlu0 %2799  ;;  %v678_v40 = vsel %vm510_vm1, %v673_v32, %v677_v33  ;;  %v2482_v35 = vshll.u32 %v3850_v31, 16 }
  0xad   : > { %2848 = vst.msk [vmem:[#allocation2] sm:$0xff] %vm2847_vm10, %v2800_v47  ;;  %1920 = vrot.lane.b32.xlu1 %v1886_v41, %s4004_s5  ;;  %v577_v41 = vor.u32 %v576_v34, %v572_v30  ;;  %v3834_v47 = vld [vmem:[%s4093_s30 + $0x44] ss:$0 sps:$4 sm:$0x11]   ;;  %v3849_v30 = vld [vmem:[%s4093_s30 + $0xb4] sm:$0xff]  }
  0xae   : > { %1904 = vrot.lane.b32.xlu0 %v1862_v48, %s4004_s5  ;;  %v961_v52 = vrot.slane %v3834_v47, 1  ;;  %v2475_v33 = vshrl.u32 %v3849_v30, 16  ;;  %v2477_v34 = vshll.u32 %v3849_v30, 16 }
  0xaf   : > { %v722_v50 = vpop.permute.xlu1 %721  ;;  %v582_v48 = vsel %vm510_vm1, %v577_v41, %v581_v42  ;;  %v2484_v41 = vrot.slane %v2482_v35, 1  ;;  %v2379_v42 = vshrl.u32 %v3851_v36, 16 }
  0xb0   : > { %761 = vst.msk [vmem:[#allocation2 + $0x48] sm:$0xff] %vm751_vm3, %v722_v50  ;;  %v706_v59 = vpop.permute.xlu0 %705  ;;  %v962_v57 = vsel %vm944_vm0, %v960_v51, %v961_v52 }
  0xb1   : > { %2101 = vrot.lane.b32.xlu1 %v3817_v45, %s4008_s9  ;;  %753 = vst.msk [vmem:[#allocation2 + $0x8] sm:$0xff] %vm751_vm3, %v706_v59  ;;  %v985_v45 = vrot.slane %v3832_v38, 1  ;;  %v3838_v59 = vld [vmem:[%s4093_s30 + $0xb0] ss:$0 sps:$4 sm:$0x11]  }
  0xb2   : > { %2085 = vrot.lane.b32.xlu0 %v3818_v49, %s4008_s9  ;;  %v1579_v0 = vshll.u32 %v3838_v59, 16  ;;  %v3856_v59 = vld [vmem:[%s4093_s30 + $0x5c] ss:$0 sps:$4 sm:$0x11]  }
  0xb3   : > { %v1012_v60 = vpop.permute.xlu1 %1011  ;;  %v2872_v61 = vld [vmem:[#allocation2 + $0x40] sm:$0xff]  ;;  %v986_v50 = vsel %vm944_vm0, %v984_v44, %v985_v45  ;;  %v2386_v44 = vshll.u32 %v3852_v39, 16  ;;  %v3853_v45 = vld [vmem:[%s4093_s30 + $0xb4] sm:$0xfe]  }
  0xb4   : > { %1051 = vst.msk [vmem:[#allocation2 + $0x48] sm:$0xff] %vm1041_vm4, %v1012_v60  ;;  %3609 = vmatprep.subr.msk.bf16.mxu0 %vm2887_vm11, %v2872_v61  ;;  %v2864_v9 = vld [vmem:[#allocation2] sm:$0xff]  ;;  %v996_v12 = vpop.permute.xlu0 %995  ;;  %v3839_v60 = vld [vmem:[%s4093_s30 + $0x48] sm:$0xff]   ;;  %v1576_v61 = vrot.slane %v1574_v56, 1  ;;  %v1581_v7 = vrot.slane %v1579_v0, 1 }
  0xb5   : > { %2534 = vrot.lane.b32.xlu1 %v2473_v5, %s4009_s10  ;;  %v2892_v6 = vsel %vm2887_vm11, %v2864_v9, 0  ;;  %1043 = vst.msk [vmem:[#allocation2 + $0x8] sm:$0xff] %vm1041_vm4, %v996_v12  ;;  %v1476_v2 = vshrl.u32 %v3839_v60, 16  ;;  %v1478_v3 = vshll.u32 %v3839_v60, 16  ;;  %v1483_v9 = vshll.u32 %v3840_v1, 16  ;;  %v3857_v60 = vld [vmem:[%s4093_s30 + $0xa8] sm:$0xff]  }
  0xb6   : > { %3592 = vmatpush3.bf16.xpose.msra.mxu0 %v2892_v6  ;;  %2518 = vrot.lane.b32.xlu0 %v2377_v15, %s4009_s10  ;;  %v1577_v5 = vor.u32 %v1576_v61, %v1572_v55  ;;  %v3842_v12 = vld [vmem:[%s4093_s30 + $0xb0] ss:$0 sps:$4 sm:$0x11]   ;;  %v2388_v51 = vrot.slane %v2386_v44, 1  ;;  %v2791_v55 = vrot.slane %v3854_v46, 1  ;;  %v2767_v1 = vrot.slane %v3856_v59, 1 }
  0xb7   : > { %v1193_v16 = vpop.permute.xlu1 %1192  ;;  %v1480_v8 = vrot.slane %v1478_v3, 1  ;;  %v1485_v15 = vrot.slane %v1483_v9, 1  ;;  %v1888_v18 = vrot.slane %v3842_v12, 1  ;;  %v680_v3 = vshrl.u32 %v3857_v60, 16 }
  0xb8   : > { %1232 = vst.msk [vmem:[#allocation2 + $0x48] sm:$0xff] %vm1222_vm5, %v1193_v16  ;;  %v1177_v24 = vpop.permute.xlu0 %1176  ;;  %v1582_v13 = vsel %vm510_vm1, %v1577_v5, %v1581_v7  ;;  %v1887_v16 = vrot.slane %v3841_v10, 1  ;;  %v682_v5 = vshll.u32 %v3857_v60, 16  ;;  %v3859_v7 = vld [vmem:[%s4093_s30 + $0x48] sm:$0xff]  }
  0xb9   : > { %2823 = vrot.lane.b32.xlu1 %v2789_v19, %s4010_s11  ;;  %1224 = vst.msk [vmem:[#allocation2 + $0x8] sm:$0xff] %vm1222_vm5, %v1177_v24  ;;  %v1481_v14 = vor.u32 %v1480_v8, %v1476_v2  ;;  %v3843_v19 = vld [vmem:[%s4093_s30 + $0x48] sm:$0xfe]   ;;  %v1864_v24 = vrot.slane %v3844_v20, 1  ;;  %v584_v12 = vshrl.u32 %v3859_v7, 16 }
  0xba   : > { %2807 = vrot.lane.b32.xlu0 %v2765_v26, %s4010_s11  ;;  %v1889_v22 = vsel %vm944_vm0, %v1887_v16, %v1888_v18  ;;  %v1863_v23 = vrot.slane %v3843_v19, 1  ;;  %v3858_v2 = vld [vmem:[%s4093_s30 + $0xb0] ss:$0 sps:$4 sm:$0x11]   ;;  %v684_v11 = vrot.slane %v682_v5, 1 }
  0xbb   : > { %v1626_v27 = vpop.permute.xlu1 %1625  ;;  %v1486_v21 = vsel %vm510_vm1, %v1481_v14, %v1485_v15  ;;  %v687_v9 = vshll.u32 %v3858_v2, 16  ;;  %v3860_v10 = vld [vmem:[%s4093_s30 + $0x50] ss:$0 sps:$4 sm:$0x11]   ;;  %v3861_v19 = vld [vmem:[%s4093_s30 + $0xa8] sm:$0xfe]  }
  0xbc   : > { %1665 = vst.msk [vmem:[#allocation2 + $0x48] sm:$0xff] %vm1655_vm6, %v1626_v27  ;;  %v1610_v37 = vpop.permute.xlu0 %1609  ;;  %v1865_v26 = vsel %vm944_vm0, %v1863_v23, %v1864_v24  ;;  %v591_v15 = vshll.u32 %v3860_v10, 16  ;;  %v685_v16 = vor.u32 %v684_v11, %v680_v3  ;;  %v3862_v20 = vld [vmem:[%s4093_s30 + $0xb0] ss:$0 sps:$4 sm:$0x11]   ;;  %v987_v24 = vrot.slane %v3861_v19, 1 }
  0xbd   : > { %1657 = vst.msk [vmem:[#allocation2 + $0x8] sm:$0xff] %vm1655_vm6, %v1610_v37  ;;  %729 = vrot.lane.b32.xlu1 %v678_v40, %s4006_s7  ;;  %v2479_v40 = vrot.slane %v2477_v34, 1  ;;  %v689_v14 = vrot.slane %v687_v9, 1  ;;  %v3869_v34 = vld [vmem:[%s4093_s30 + $0x54] sm:$0xff]   ;;  %v3879_v9 = vld [vmem:[%s4093_s30 + $0xc0] sm:$0xff]  }
  0xbe   : > { %713 = vrot.lane.b32.xlu0 %v582_v48, %s4006_s7  ;;  %v1488_v39 = vshrl.u32 %v3869_v34, 16  ;;  %v1490_v44 = vshll.u32 %v3869_v34, 16  ;;  %v3872_v59 = vld [vmem:[%s4093_s30 + $0xbc] ss:$0 sps:$4 sm:$0x11]   ;;  %v3877_v10 = vld [vmem:[%s4093_s30 + $0xc0] sm:$0xff]  }
  0xbf   : > { %v1915_v43 = vpop.permute.xlu1 %1914  ;;  %v2480_v48 = vor.u32 %v2479_v40, %v2475_v33 }
  0xc0   : > { %1954 = vst.msk [vmem:[#allocation2 + $0x48] sm:$0xff] %vm1944_vm7, %v1915_v43  ;;  %v1899_v49 = vpop.permute.xlu0 %1898  ;;  %v2381_v43 = vshll.u32 %v3851_v36, 16  ;;  %v3865_v36 = vld [vmem:[%s4093_s30 + $0xb4] sm:$0xff]  }
  0xc1   : > { %1946 = vst.msk [vmem:[#allocation2 + $0x8] sm:$0xff] %vm1944_vm7, %v1899_v49  ;;  %1019 = vrot.lane.b32.xlu1 %v986_v50, %s4005_s6  ;;  %v2485_v56 = vsel %vm510_vm1, %v2480_v48, %v2484_v41 }
  0xc2   : > { %1003 = vrot.lane.b32.xlu0 %v962_v57, %s4005_s6  ;;  %v2383_v49 = vrot.slane %v2381_v43, 1  ;;  %v3868_v43 = vld [vmem:[%s4093_s30 + $0xbc] ss:$0 sps:$4 sm:$0x11]  }
  0xc3   : > { %v2096_v54 = vpop.permute.xlu1 %2095  ;;  %v1591_v48 = vshll.u32 %v3868_v43, 16  ;;  %v3885_v43 = vld [vmem:[%s4093_s30 + $0x60] sm:$0xfe]  }
  0xc4   : > { %2135 = vst.msk [vmem:[#allocation2 + $0x48] sm:$0xff] %vm2125_vm8, %v2096_v54  ;;  %v2080_v63 = vpop.permute.xlu0 %2079  ;;  %v2790_v54 = vrot.slane %v3853_v45, 1  ;;  %v2384_v57 = vor.u32 %v2383_v49, %v2379_v42  ;;  %v3866_v42 = vld [vmem:[%s4093_s30 + $0x54] sm:$0xff]   ;;  %v3870_v49 = vld [vmem:[%s4093_s30 + $0x5c] ss:$0 sps:$4 sm:$0x11]  }
  0xc5   : > { %2127 = vst.msk [vmem:[#allocation2 + $0x8] sm:$0xff] %vm2125_vm8, %v2080_v63  ;;  %1200 = vrot.lane.b32.xlu1 %v3835_v53, %s4003_s4 }
  0xc6   : > { %1184 = vrot.lane.b32.xlu0 %v3836_v58, %s4003_s4  ;;  %v3855_v58 = vld [vmem:[%s4093_s30 + $0x54] sm:$0xfe]   ;;  %v2792_v61 = vsel %vm944_vm0, %v2790_v54, %v2791_v55  ;;  %v2389_v62 = vsel %vm510_vm1, %v2384_v57, %v2388_v51  ;;  %v3876_v51 = vld [vmem:[%s4093_s30 + $0x24] sm:$0xff]   ;;  %v1593_v54 = vrot.slane %v1591_v48, 1  ;;  %v2769_v48 = vrot.slane %v3885_v43, 1 }
  0xc7   : > { %v2529_v4 = vpop.permute.xlu1 %2528  ;;  %v2766_v0 = vrot.slane %v3855_v58, 1  ;;  %v3871_v57 = vld [vmem:[%s4093_s30 + $0xb4] sm:$0xfe]   ;;  %321 = vst.msk [vmem:[#allocation2 + $0x18] sm:$0xff] %vm317_vm2, %v3876_v51 }
  0xc8   : > { %2568 = vst.msk [vmem:[#allocation2 + $0x48] sm:$0xff] %vm2558_vm9, %v2529_v4  ;;  %v2513_v6 = vpop.permute.xlu0 %2512 }
  0xc9   : > { %2560 = vst.msk [vmem:[#allocation2 + $0x8] sm:$0xff] %vm2558_vm9, %v2513_v6  ;;  %1633 = vrot.lane.b32.xlu1 %v1582_v13, %s4007_s8  ;;  %v2768_v8 = vsel %vm944_vm0, %v2766_v0, %v2767_v1  ;;  %v586_v6 = vshll.u32 %v3859_v7, 16  ;;  %v1891_v0 = vrot.slane %v3872_v59, 1  ;;  %v3874_v1 = vld [vmem:[%s4093_s30 + $0x5c] ss:$0 sps:$4 sm:$0x11]  }
  0xca   : > { %1617 = vrot.lane.b32.xlu0 %v1486_v21, %s4007_s8  ;;  %v593_v21 = vrot.slane %v591_v15, 1  ;;  %v1867_v7 = vrot.slane %v3874_v1, 1  ;;  %v2489_v15 = vshll.u32 %v3879_v9, 16  ;;  %v3892_v1 = vld [vmem:[%s4093_s30 + $0xbc] ss:$0 sps:$4 sm:$0x11]  }
  0xcb   : > { %v2818_v17 = vpop.permute.xlu1 %2817 }
  0xcc   : > { %2857 = vst.msk [vmem:[#allocation2 + $0x48] sm:$0xff] %vm2847_vm10, %v2818_v17  ;;  %v2802_v25 = vpop.permute.xlu0 %2801  ;;  %v588_v17 = vrot.slane %v586_v6, 1  ;;  %v3878_v6 = vld [vmem:[%s4093_s30 + $0x60] sm:$0xff]   ;;  %v2491_v19 = vrot.slane %v2489_v15, 1 }
  0xcd   : > { %2849 = vst.msk [vmem:[#allocation2 + $0x8] sm:$0xff] %vm2847_vm10, %v2802_v25  ;;  %1922 = vrot.lane.b32.xlu1 %v1889_v22, %s4004_s5  ;;  %v690_v22 = vsel %vm510_vm1, %v685_v16, %v689_v14  ;;  %v988_v25 = vrot.slane %v3862_v20, 1  ;;  %v2487_v14 = vshrl.u32 %v3879_v9, 16  ;;  %v3881_v16 = vld [vmem:[%s4093_s30 + $0x60] sm:$0xff]   ;;  %v3893_v9 = vld [vmem:[%s4093_s30 + $0x54] sm:$0xfe]  }
  0xce   : > { %1906 = vrot.lane.b32.xlu0 %v1865_v26, %s4004_s5  ;;  %v589_v23 = vor.u32 %v588_v17, %v584_v12  ;;  %v3863_v26 = vld [vmem:[%s4093_s30 + $0x48] sm:$0xfe]   ;;  %v3895_v15 = vld [vmem:[%s4093_s30 + $0xc0] sm:$0xff]  }
  0xcf   : > { %v724_v27 = vpop.permute.xlu1 %723  ;;  %v989_v31 = vsel %vm944_vm0, %v987_v24, %v988_v25  ;;  %v2492_v25 = vor.u32 %v2491_v19, %v2487_v14 }
  0xd0   : > { %762 = vst.msk [vmem:[#allocation2 + $0x50] sm:$0xff] %vm751_vm3, %v724_v27  ;;  %v708_v32 = vpop.permute.xlu0 %707  ;;  %v594_v30 = vsel %vm510_vm1, %v589_v23, %v593_v21  ;;  %v2391_v21 = vshrl.u32 %v3881_v16, 16  ;;  %v3882_v23 = vld [vmem:[%s4093_s30 + $0x68] ss:$0 sps:$4 sm:$0x11]  }
  0xd1   : > { %754 = vst.msk [vmem:[#allocation2 + $0x10] sm:$0xff] %vm751_vm3, %v708_v32  ;;  %2103 = vrot.lane.b32.xlu1 %v3847_v28, %s4008_s9  ;;  %v3864_v28 = vld [vmem:[%s4093_s30 + $0x50] ss:$0 sps:$4 sm:$0x11]   ;;  %v963_v32 = vrot.slane %v3863_v26, 1 }
  0xd2   : > { %2087 = vrot.lane.b32.xlu0 %v3848_v29, %s4008_s9  ;;  %v3867_v29 = vld [vmem:[%s4093_s30 + $0xb4] sm:$0xff]   ;;  %v964_v35 = vrot.slane %v3864_v28, 1 }
  0xd3   : > { %v1014_v37 = vpop.permute.xlu1 %1013  ;;  %v2873_v38 = vld [vmem:[#allocation2 + $0x48] sm:$0xff] }
  0xd4   : > { %1052 = vst.msk [vmem:[#allocation2 + $0x50] sm:$0xff] %vm1041_vm4, %v1014_v37  ;;  %3610 = vmatprep.subr.msk.bf16.mxu0 %vm2887_vm11, %v2873_v38  ;;  %v998_v47 = vpop.permute.xlu0 %997  ;;  %v2865_v50 = vld [vmem:[#allocation2 + $0x8] sm:$0xff]  ;;  %v1584_v37 = vshrl.u32 %v3867_v29, 16  ;;  %v1586_v38 = vshll.u32 %v3867_v29, 16  ;;  %v965_v40 = vsel %vm944_vm0, %v963_v32, %v964_v35  ;;  %v3887_v29 = vld [vmem:[%s4093_s30 + $0xb4] sm:$0xff]  }
  0xd5   : > { %1044 = vst.msk [vmem:[#allocation2 + $0x10] sm:$0xff] %vm1041_vm4, %v998_v47  ;;  %v2895_v52 = vsel %vm2887_vm11, %v2865_v50, 0  ;;  %2536 = vrot.lane.b32.xlu1 %v2485_v56, %s4009_s10  ;;  %v3875_v47 = vld [vmem:[%s4093_s30 + $0x84] sm:$0xff]   ;;  %v1492_v50 = vrot.slane %v1490_v44, 1  ;;  %v1495_v56 = vshll.u32 %v3870_v49, 16  ;;  %v694_v51 = vshll.u32 %v3887_v29, 16 }
  0xd6   : > { %3594 = vmatpush3.bf16.xpose.msra.mxu0 %v2895_v52  ;;  %2520 = vrot.lane.b32.xlu0 %v2389_v62, %s4009_s10  ;;  %v1588_v46 = vrot.slane %v1586_v38, 1  ;;  %329 = vst.msk [vmem:[#allocation2 + $0x58] sm:$0xff] %vm317_vm2, %v3875_v47  ;;  %v1890_v62 = vrot.slane %v3871_v57, 1  ;;  %v3886_v44 = vld [vmem:[%s4093_s30 + $0x68] ss:$0 sps:$4 sm:$0x11]  }
  0xd7   : > { %v1195_v53 = vpop.permute.xlu1 %1194  ;;  %v1493_v55 = vor.u32 %v1492_v50, %v1488_v39  ;;  %v2770_v49 = vrot.slane %v3886_v44, 1  ;;  %v3888_v50 = vld [vmem:[%s4093_s30 + $0xbc] ss:$0 sps:$4 sm:$0x11]  }
  0xd8   : > { %1233 = vst.msk [vmem:[#allocation2 + $0x50] sm:$0xff] %vm1222_vm5, %v1195_v53  ;;  %v1179_v63 = vpop.permute.xlu0 %1178  ;;  %v1589_v52 = vor.u32 %v1588_v46, %v1584_v37  ;;  %v1892_v5 = vsel %vm944_vm0, %v1890_v62, %v1891_v0  ;;  %v692_v37 = vshrl.u32 %v3887_v29, 16 }
  0xd9   : > { %1225 = vst.msk [vmem:[#allocation2 + $0x10] sm:$0xff] %vm1222_vm5, %v1179_v63  ;;  %2825 = vrot.lane.b32.xlu1 %v2792_v61, %s4010_s11  ;;  %v1497_v61 = vrot.slane %v1495_v56, 1  ;;  %v3873_v63 = vld [vmem:[%s4093_s30 + $0x54] sm:$0xfe]  }
  0xda   : > { %2809 = vrot.lane.b32.xlu0 %v2768_v8, %s4010_s11  ;;  %v1594_v60 = vsel %vm510_vm1, %v1589_v52, %v1593_v54  ;;  %v2771_v52 = vsel %vm944_vm0, %v2769_v48, %v2770_v49  ;;  %v696_v54 = vrot.slane %v694_v51, 1  ;;  %v3890_v56 = vld [vmem:[%s4093_s30 + $0x5c] ss:$0 sps:$4 sm:$0x11]  }
  0xdb   : > { %v1628_v4 = vpop.permute.xlu1 %1627  ;;  %v1498_v2 = vsel %vm510_vm1, %v1493_v55, %v1497_v61  ;;  %v699_v55 = vshll.u32 %v3888_v50, 16  ;;  %v603_v62 = vshll.u32 %v3890_v56, 16 }
  0xdc   : > { %1666 = vst.msk [vmem:[#allocation2 + $0x50] sm:$0xff] %vm1655_vm6, %v1628_v4  ;;  %v1612_v13 = vpop.permute.xlu0 %1611  ;;  %v1866_v4 = vrot.slane %v3873_v63, 1  ;;  %v3891_v63 = vld [vmem:[%s4093_s30 + $0xb4] sm:$0xfe]  }
  0xdd   : > { %1658 = vst.msk [vmem:[#allocation2 + $0x10] sm:$0xff] %vm1655_vm6, %v1612_v13  ;;  %731 = vrot.lane.b32.xlu1 %v690_v22, %s4006_s7  ;;  %v3880_v13 = vld [vmem:[%s4093_s30 + $0xc8] ss:$0 sps:$4 sm:$0x11]   ;;  %v2393_v22 = vshll.u32 %v3881_v16, 16  ;;  %v701_v61 = vrot.slane %v699_v55, 1 }
  0xde   : > { %715 = vrot.lane.b32.xlu0 %v594_v30, %s4006_s7  ;;  %v1868_v11 = vsel %vm944_vm0, %v1866_v4, %v1867_v7  ;;  %v2494_v20 = vshll.u32 %v3880_v13, 16  ;;  %v2398_v30 = vshll.u32 %v3882_v23, 16  ;;  %v966_v13 = vrot.slane %v3893_v9, 1  ;;  %v3897_v16 = vld [vmem:[%s4093_s30 + $0xc0] sm:$0xff]  }
  0xdf   : > { %v1917_v18 = vpop.permute.xlu1 %1916  ;;  %v3899_v23 = vld [vmem:[%s4093_s30 + $0x60] sm:$0xff]  }
  0xe0   : > { %1955 = vst.msk [vmem:[#allocation2 + $0x50] sm:$0xff] %vm1944_vm7, %v1917_v18  ;;  %v1901_v27 = vpop.permute.xlu0 %1900  ;;  %v2496_v26 = vrot.slane %v2494_v20, 1  ;;  %v2400_v38 = vrot.slane %v2398_v30, 1  ;;  %v3898_v20 = vld [vmem:[%s4093_s30 + $0xc8] ss:$0 sps:$4 sm:$0x11]  }
  0xe1   : > { %1947 = vst.msk [vmem:[#allocation2 + $0x10] sm:$0xff] %vm1944_vm7, %v1901_v27  ;;  %1021 = vrot.lane.b32.xlu1 %v989_v31, %s4005_s6  ;;  %v2395_v27 = vrot.slane %v2393_v22, 1  ;;  %v1598_v22 = vshll.u32 %v3897_v16, 16  ;;  %v1502_v30 = vshll.u32 %v3899_v23, 16 }
  0xe2   : > { %1005 = vrot.lane.b32.xlu0 %v965_v40, %s4005_s6  ;;  %v2497_v34 = vsel %vm510_vm1, %v2492_v25, %v2496_v26  ;;  %v3889_v40 = vld [vmem:[%s4093_s30 + $0x54] sm:$0xff]   ;;  %v1603_v26 = vshll.u32 %v3898_v20, 16 }
  0xe3   : > { %v2098_v33 = vpop.permute.xlu1 %2097  ;;  %v2396_v35 = vor.u32 %v2395_v27, %v2391_v21  ;;  %v596_v57 = vshrl.u32 %v3889_v40, 16  ;;  %v1596_v21 = vshrl.u32 %v3897_v16, 16  ;;  %v1600_v25 = vrot.slane %v1598_v22, 1  ;;  %v3900_v27 = vld [vmem:[%s4093_s30 + $0x68] ss:$0 sps:$4 sm:$0x11]  }
  0xe4   : > { %2136 = vst.msk [vmem:[#allocation2 + $0x50] sm:$0xff] %vm2125_vm8, %v2098_v33  ;;  %v2082_v41 = vpop.permute.xlu0 %2081  ;;  %v3883_v33 = vld [vmem:[%s4093_s30 + $0xc0] sm:$0xfe]  }
  0xe5   : > { %2128 = vst.msk [vmem:[#allocation2 + $0x10] sm:$0xff] %vm2125_vm8, %v2082_v41  ;;  %1202 = vrot.lane.b32.xlu1 %v3865_v36, %s4003_s4  ;;  %v3884_v36 = vld [vmem:[%s4093_s30 + $0xc8] ss:$0 sps:$4 sm:$0x11]   ;;  %v2793_v39 = vrot.slane %v3883_v33, 1  ;;  %v1605_v33 = vrot.slane %v1603_v26, 1 }
  0xe6   : > { %1186 = vrot.lane.b32.xlu0 %v3866_v42, %s4003_s4  ;;  %v2794_v42 = vrot.slane %v3884_v36, 1  ;;  %v3901_v36 = vld [vmem:[%s4093_s30 + $0xc0] sm:$0xfe]  }
  0xe7   : > { %v2531_v45 = vpop.permute.xlu1 %2530 }
  0xe8   : > { %2569 = vst.msk [vmem:[#allocation2 + $0x50] sm:$0xff] %vm2558_vm9, %v2531_v45  ;;  %v2515_v53 = vpop.permute.xlu0 %2514  ;;  %v2401_v45 = vsel %vm510_vm1, %v2396_v35, %v2400_v38  ;;  %v2795_v47 = vsel %vm944_vm0, %v2793_v39, %v2794_v42  ;;  %v3902_v38 = vld [vmem:[%s4093_s30 + $0xc8] ss:$0 sps:$4 sm:$0x11]  }
  0xe9   : > { %2561 = vst.msk [vmem:[#allocation2 + $0x10] sm:$0xff] %vm2558_vm9, %v2515_v53  ;;  %1635 = vrot.lane.b32.xlu1 %v1594_v60, %s4007_s8  ;;  %v697_v60 = vor.u32 %v696_v54, %v692_v37  ;;  %v1504_v37 = vrot.slane %v1502_v30, 1  ;;  %v1894_v44 = vrot.slane %v3902_v38, 1  ;;  %v3907_v54 = vld [vmem:[%s4093_s30 + $0xcc] sm:$0xff]   ;;  %v4663_v38 = vld [vmem:[%s4790_s1] sm:$0xf] }
  0xea   : > { %1619 = vrot.lane.b32.xlu0 %v1498_v2, %s4007_s8  ;;  %3607 = vmatprep.mubr.msk.bf16.mxu0 %vm2887_vm11, %v4663_v38 }
  0xeb   : > { %v2820_v58 = vpop.permute.xlu1 %2819  ;;  %v702_v2 = vsel %vm510_vm1, %v697_v60, %v701_v61  ;;  %v3910_v60 = vld [vmem:[%s4093_s30 + $0xd4] ss:$0 sps:$4 sm:$0x11]   ;;  %v3911_v61 = vld [vmem:[%s4093_s30 + $0x6c] sm:$0xff]  }
  0xec   : > { %2858 = vst.msk [vmem:[#allocation2 + $0x50] sm:$0xff] %vm2847_vm10, %v2820_v58  ;;  %v2804_v3 = vpop.permute.xlu0 %2803  ;;  %v598_v58 = vshll.u32 %v3889_v40, 16 }
  0xed   : > { %2850 = vst.msk [vmem:[#allocation2 + $0x10] sm:$0xff] %vm2847_vm10, %v2804_v3  ;;  %1924 = vrot.lane.b32.xlu1 %v1892_v5, %s4004_s5  ;;  %v605_v3 = vrot.slane %v603_v62, 1  ;;  %v990_v5 = vrot.slane %v3891_v63, 1 }
  0xee   : > { %1908 = vrot.lane.b32.xlu0 %v1868_v11, %s4004_s5  ;;  %v600_v0 = vrot.slane %v598_v58, 1  ;;  %v3908_v58 = vld [vmem:[%s4093_s30 + $0x6c] sm:$0xff]  }
  0xef   : > { %v726_v8 = vpop.permute.xlu1 %725 }
  0xf0   : > { %763 = vst.msk [vmem:[#allocation2 + $0x58] sm:$0xff] %vm751_vm3, %v726_v8  ;;  %v710_v12 = vpop.permute.xlu0 %709  ;;  %v601_v7 = vor.u32 %v600_v0, %v596_v57  ;;  %v991_v8 = vrot.slane %v3892_v1, 1  ;;  %v2506_v1 = vshll.u32 %v3910_v60, 16 }
  0xf1   : > { %755 = vst.msk [vmem:[#allocation2 + $0x18] sm:$0xff] %vm751_vm3, %v710_v12  ;;  %2105 = vrot.lane.b32.xlu1 %v3877_v10, %s4008_s9  ;;  %v3894_v10 = vld [vmem:[%s4093_s30 + $0x5c] ss:$0 sps:$4 sm:$0x11]  }
  0xf2   : > { %2089 = vrot.lane.b32.xlu0 %v3878_v6, %s4008_s9  ;;  %v606_v12 = vsel %vm510_vm1, %v601_v7, %v605_v3  ;;  %v992_v6 = vsel %vm944_vm0, %v990_v5, %v991_v8  ;;  %v967_v14 = vrot.slane %v3894_v10, 1  ;;  %v2403_v3 = vshrl.u32 %v3911_v61, 16  ;;  %v3917_v8 = vld [vmem:[%s4093_s30 + $0x9c] sm:$0xff]  }
  0xf3   : > { %v1016_v17 = vpop.permute.xlu1 %1015  ;;  %v2874_v18 = vld [vmem:[#allocation2 + $0x50] sm:$0xff]  ;;  %v2508_v10 = vrot.slane %v2506_v1, 1  ;;  %331 = vst.msk [vmem:[#allocation2 + $0x68] sm:$0xff] %vm317_vm2, %v3917_v8 }
  0xf4   : > { %1053 = vst.msk [vmem:[#allocation2 + $0x58] sm:$0xff] %vm1041_vm4, %v1016_v17  ;;  %3611 = vmatprep.subr.msk.bf16.mxu0 %vm2887_vm11, %v2874_v18  ;;  %v1000_v24 = vpop.permute.xlu0 %999  ;;  %v2866_v28 = vld [vmem:[#allocation2 + $0x10] sm:$0xff]  ;;  %v968_v18 = vsel %vm944_vm0, %v966_v13, %v967_v14  ;;  %v3918_v14 = vld [vmem:[%s4093_s30 + $0x3c] sm:$0xff]  }
  0xf5   : > { %1045 = vst.msk [vmem:[#allocation2 + $0x18] sm:$0xff] %vm1041_vm4, %v1000_v24  ;;  %v2898_v31 = vsel %vm2887_vm11, %v2866_v28, 0  ;;  %2538 = vrot.lane.b32.xlu1 %v2497_v34, %s4009_s10  ;;  %v3896_v24 = vld [vmem:[%s4093_s30 + $0x60] sm:$0xff]   ;;  %v1500_v28 = vshrl.u32 %v3899_v23, 16  ;;  %v1507_v34 = vshll.u32 %v3900_v27, 16 }
  0xf6   : > { %3596 = vmatpush3.bf16.xpose.msra.mxu0 %v2898_v31  ;;  %2522 = vrot.lane.b32.xlu0 %v2401_v45, %s4009_s10  ;;  %v3905_v31 = vld [vmem:[%s4093_s30 + $0x90] sm:$0xff]   ;;  %v3903_v45 = vld [vmem:[%s4093_s30 + $0x60] sm:$0xfe]   ;;  %323 = vst.msk [vmem:[#allocation2 + $0x28] sm:$0xff] %vm317_vm2, %v3918_v14 }
  0xf7   : > { %v1197_v32 = vpop.permute.xlu1 %1196  ;;  %330 = vst.msk [vmem:[#allocation2 + $0x60] sm:$0xff] %vm317_vm2, %v3905_v31  ;;  %v1509_v40 = vrot.slane %v1507_v34, 1  ;;  %v1505_v42 = vor.u32 %v1504_v37, %v1500_v28  ;;  %v1869_v50 = vrot.slane %v3903_v45, 1  ;;  %v3913_v13 = vld [vmem:[%s4093_s30 + $0xcc] sm:$0xfe]   ;;  %v3922_v37 = vld [vmem:[%s4093_s30 + $0x54] sm:$0xff]  }
  0xf8   : > { %1234 = vst.msk [vmem:[#allocation2 + $0x58] sm:$0xff] %vm1222_vm5, %v1197_v32  ;;  %v1181_v41 = vpop.permute.xlu0 %1180  ;;  %v1601_v32 = vor.u32 %v1600_v25, %v1596_v21  ;;  %v2796_v20 = vrot.slane %v3913_v13, 1  ;;  %v3919_v21 = vld [vmem:[%s4093_s30 + $0xa8] sm:$0xff]   ;;  %v3916_v25 = vld [vmem:[%s4093_s30 + $0x74] ss:$0 sps:$4 sm:$0x11]  }
  0xf9   : > { %1226 = vst.msk [vmem:[#allocation2 + $0x18] sm:$0xff] %vm1222_vm5, %v1181_v41  ;;  %2827 = vrot.lane.b32.xlu1 %v2795_v47, %s4010_s11  ;;  %v1893_v41 = vrot.slane %v3901_v36, 1  ;;  %v1510_v48 = vsel %vm510_vm1, %v1505_v42, %v1509_v40  ;;  %v2773_v30 = vrot.slane %v3916_v25, 1  ;;  %v3920_v34 = vld [vmem:[%s4093_s30 + $0x48] sm:$0xff]   ;;  %v2881_v40 = vld [vmem:[%s4791_s2] sm:$0xff]  ;;  %v4011_v42 = vmov 0  }
  0xfa   : > { %2811 = vrot.lane.b32.xlu0 %v2771_v52, %s4010_s11  ;;  %v1606_v39 = vsel %vm510_vm1, %v1601_v32, %v1605_v33  ;;  %v3906_v52 = vld [vmem:[%s4093_s30 + $0x30] sm:$0xff]   ;;  %332 = vst.msk [vmem:[#allocation2 + $0x70] sm:$0xff] %vm317_vm2, %v3919_v21  ;;  %324 = vst.msk [vmem:[#allocation2 + $0x30] sm:$0xff] %vm317_vm2, %v3920_v34 }
  0xfb   : > { %v1630_v46 = vpop.permute.xlu1 %1629  ;;  %v1895_v49 = vsel %vm944_vm0, %v1893_v41, %v1894_v44  ;;  %322 = vst.msk [vmem:[#allocation2 + $0x20] sm:$0xff] %vm317_vm2, %v3906_v52  ;;  %325 = vst.msk [vmem:[#allocation2 + $0x38] sm:$0xff] %vm317_vm2, %v3922_v37  ;;  %3682 = vset.pattern.permute.xlu0 %v4011_v42 }
  0xfc   : > { %1667 = vst.msk [vmem:[#allocation2 + $0x58] sm:$0xff] %vm1655_vm6, %v1630_v46  ;;  %v1614_v53 = vpop.permute.xlu0 %1613  ;;  %v3904_v46 = vld [vmem:[%s4093_s30 + $0x68] ss:$0 sps:$4 sm:$0x11]  }
  0xfd   : > { %1659 = vst.msk [vmem:[#allocation2 + $0x18] sm:$0xff] %vm1655_vm6, %v1614_v53  ;;  %733 = vrot.lane.b32.xlu1 %v702_v2, %s4006_s7  ;;  %v1870_v51 = vrot.slane %v3904_v46, 1  ;;  %v3912_v2 = vld [vmem:[%s4093_s30 + $0x74] ss:$0 sps:$4 sm:$0x11]  }
  0xfe   : > { %717 = vrot.lane.b32.xlu0 %v606_v12, %s4006_s7 }
  0xff   : > { %v1919_v59 = vpop.permute.xlu1 %1918  ;;  %v1871_v55 = vsel %vm944_vm0, %v1869_v50, %v1870_v51 }
 0x100   : > { %1956 = vst.msk [vmem:[#allocation2 + $0x58] sm:$0xff] %vm1944_vm7, %v1919_v59  ;;  %v1903_v4 = vpop.permute.xlu0 %1902  ;;  %v3909_v59 = vld [vmem:[%s4093_s30 + $0xcc] sm:$0xff]  }
 0x101   : > { %1948 = vst.msk [vmem:[#allocation2 + $0x18] sm:$0xff] %vm1944_vm7, %v1903_v4  ;;  %1023 = vrot.lane.b32.xlu1 %v992_v6, %s4005_s6  ;;  %v2499_v63 = vshrl.u32 %v3909_v59, 16  ;;  %v2501_v0 = vshll.u32 %v3909_v59, 16  ;;  %v2405_v4 = vshll.u32 %v3911_v61, 16 }
 0x102   : > { %1007 = vrot.lane.b32.xlu0 %v968_v18, %s4005_s6  ;;  %v3914_v18 = vld [vmem:[%s4093_s30 + $0xd4] ss:$0 sps:$4 sm:$0x11]   ;;  %s4742_s6 = scalar_lea.hbm %s4792_s3, %s3590_s28 }
 0x103   : > { %v2100_v11 = vpop.permute.xlu1 %2099  ;;  %v2503_v9 = vrot.slane %v2501_v0, 1  ;;  %v2407_v6 = vrot.slane %v2405_v4, 1  ;;  %v2797_v23 = vrot.slane %v3914_v18, 1 }
 0x104   : > { %2137 = vst.msk [vmem:[#allocation2 + $0x58] sm:$0xff] %vm2125_vm8, %v2100_v11  ;;  %v2084_v17 = vpop.permute.xlu0 %2083  ;;  %v2410_v11 = vshll.u32 %v3912_v2, 16 }
 0x105   : > { %2129 = vst.msk [vmem:[#allocation2 + $0x18] sm:$0xff] %vm2125_vm8, %v2084_v17  ;;  %1204 = vrot.lane.b32.xlu1 %v3895_v15, %s4003_s4  ;;  %v2504_v15 = vor.u32 %v2503_v9, %v2499_v63  ;;  %v2798_v28 = vsel %vm944_vm0, %v2796_v20, %v2797_v23 }
 0x106   : > { %1188 = vrot.lane.b32.xlu0 %v3896_v24, %s4003_s4  ;;  %v2412_v16 = vrot.slane %v2410_v11, 1  ;;  %v3915_v24 = vld [vmem:[%s4093_s30 + $0x6c] sm:$0xfe]  }
 0x107   : > { %v2533_v19 = vpop.permute.xlu1 %2532  ;;  %v2509_v22 = vsel %vm510_vm1, %v2504_v15, %v2508_v10 }
 0x108   : > { %2570 = vst.msk [vmem:[#allocation2 + $0x58] sm:$0xff] %vm2558_vm9, %v2533_v19  ;;  %v2517_v29 = vpop.permute.xlu0 %2516  ;;  %v2408_v19 = vor.u32 %v2407_v6, %v2403_v3 }
 0x109   : > { %2562 = vst.msk [vmem:[#allocation2 + $0x18] sm:$0xff] %vm2558_vm9, %v2517_v29  ;;  %1637 = vrot.lane.b32.xlu1 %v1606_v39, %s4007_s8  ;;  %v2772_v29 = vrot.slane %v3915_v24, 1 }
 0x10a   : > { %1621 = vrot.lane.b32.xlu0 %v1510_v48, %s4007_s8  ;;  %v2413_v27 = vsel %vm510_vm1, %v2408_v19, %v2412_v16  ;;  %s4012_s8 = smov [#allocation3]  }
 0x10b   : > { %v2822_v35 = vpop.permute.xlu1 %2821  ;;  %v2774_v32 = vsel %vm944_vm0, %v2772_v29, %v2773_v30 }
 0x10c   : > { %2859 = vst.msk [vmem:[#allocation2 + $0x58] sm:$0xff] %vm2847_vm10, %v2822_v35  ;;  %v2806_v43 = vpop.permute.xlu0 %2805  ;;  %v3921_v35 = vld [vmem:[%s4093_s30 + $0xb4] sm:$0xff]   ;;  %s3001_s30 = sshll.u32 %s177_s29, 4  ;;  %s4744_s30 = int_to_ptr.vmem [resolvable:$true] %s3001_s30 }
 0x10d   : > { %2851 = vst.msk [vmem:[#allocation2 + $0x18] sm:$0xff] %vm2847_vm10, %v2806_v43  ;;  %1926 = vrot.lane.b32.xlu1 %v1895_v49, %s4004_s5  ;;  %s3923_s7 = scalar_lea.vmem %s4744_s30, 256 }
 0x10e   : > { %1910 = vrot.lane.b32.xlu0 %v1871_v55, %s4004_s5  ;;  %333 = vst.msk [vmem:[#allocation2 + $0x78] sm:$0xff] %vm317_vm2, %v3921_v35  ;;  %p3924_p12 = scmp.ne.s32.totalorder %s4744_s30, %s3923_s7 }
 0x10f   : > { %v728_v47 = vpop.permute.xlu1 %727 }
 0x110   : > { %764 = vst.msk [vmem:[#allocation2 + $0x60] sm:$0xff] %vm751_vm3, %v728_v47  ;;  %v712_v53 = vpop.permute.xlu0 %711  ;;  %p3925_p13 = pnand %p3924_p12, %p4073_p4 }
 0x111   : > { %756 = vst.msk [vmem:[#allocation2 + $0x20] sm:$0xff] %vm751_vm3, %v712_v53  ;;  %2107 = vrot.lane.b32.xlu1 %v3907_v54, %s4008_s9 }
 0x112   : > { %2091 = vrot.lane.b32.xlu0 %v3908_v58, %s4008_s9  ;;  %p3926_p0 = pneg %p3925_p13  ;;  %s3927_s9 = sshll.u32 %s4012_s8, 4  ;;  %s3928_s9 = int_to_ptr.vmem [resolvable:$false] %s3927_s9 }
 0x113   : > { %v1018_v56 = vpop.permute.xlu1 %1017  ;;  %v2875_v57 = vld [vmem:[#allocation2 + $0x58] sm:$0xff]  ;;  %p3930_p1 = scmp.lt.s32.totalorder %s4744_s30, %s3928_s9 }
 0x114   : > { %1054 = vst.msk [vmem:[#allocation2 + $0x60] sm:$0xff] %vm1041_vm4, %v1018_v56  ;;  %3612 = vmatprep.subr.msk.bf16.mxu0 %vm2887_vm11, %v2875_v57  ;;  %v1002_v62 = vpop.permute.xlu0 %1001  ;;  %v2867_v5 = vld [vmem:[#allocation2 + $0x18] sm:$0xff] }
 0x115   : > { %1046 = vst.msk [vmem:[#allocation2 + $0x20] sm:$0xff] %vm1041_vm4, %v1002_v62  ;;  %v2901_v12 = vsel %vm2887_vm11, %v2867_v5, 0  ;;  %2540 = vrot.lane.b32.xlu1 %v2509_v22, %s4009_s10 }
 0x116   : > { %3598 = vmatpush3.bf16.xpose.msra.mxu0 %v2901_v12  ;;  %2524 = vrot.lane.b32.xlu0 %v2413_v27, %s4009_s10  ;;  %s3929_s10 = scalar_lea.vmem %s3928_s9, 512 }
 0x117   : > { %v1199_v7 = vpop.permute.xlu1 %1198  ;;  %p3931_p2 = scmp.lt.s32.totalorder %s3929_s10, %s3923_s7 }
 0x118   : > { %1235 = vst.msk [vmem:[#allocation2 + $0x60] sm:$0xff] %vm1222_vm5, %v1199_v7  ;;  %v1183_v17 = vpop.permute.xlu0 %1182 }
 0x119   : > { %1227 = vst.msk [vmem:[#allocation2 + $0x20] sm:$0xff] %vm1222_vm5, %v1183_v17  ;;  %2829 = vrot.lane.b32.xlu1 %v2798_v28, %s4010_s11  ;;  %p3932_p3 = por %p3931_p2, %p3930_p1 }
 0x11a   : > { %2813 = vrot.lane.b32.xlu0 %v2774_v32, %s4010_s11 }
 0x11b   : > { %v1632_v26 = vpop.permute.xlu1 %1631  ;;  %p3933_p5 = pnand %p3932_p3, %p3926_p0 }
 0x11c   : > { %1668 = vst.msk [vmem:[#allocation2 + $0x60] sm:$0xff] %vm1655_vm6, %v1632_v26  ;;  %v1616_v31 = vpop.permute.xlu0 %1615 }
 0x11d   : > { %1660 = vst.msk [vmem:[#allocation2 + $0x20] sm:$0xff] %vm1655_vm6, %v1616_v31 }
 0x11e   : > { %2884 = vperm.xlu0 %3682, %v2881_v40  }
 0x11f   : > { %v1921_v33 = vpop.permute.xlu1 %1920 }
 0x120   : > { %1957 = vst.msk [vmem:[#allocation2 + $0x60] sm:$0xff] %vm1944_vm7, %v1921_v33  ;;  %v1905_v36 = vpop.permute.xlu0 %1904 }
 0x121   : > { %1949 = vst.msk [vmem:[#allocation2 + $0x20] sm:$0xff] %vm1944_vm7, %v1905_v36 }
 0x123   : > { %v2102_v39 = vpop.permute.xlu1 %2101 }
 0x124   : > { %2138 = vst.msk [vmem:[#allocation2 + $0x60] sm:$0xff] %vm2125_vm8, %v2102_v39  ;;  %v2086_v41 = vpop.permute.xlu0 %2085 }
 0x125   : > { %2130 = vst.msk [vmem:[#allocation2 + $0x20] sm:$0xff] %vm2125_vm8, %v2086_v41 }
 0x127   : > { %v2535_v43 = vpop.permute.xlu1 %2534 }
 0x128   : > { %2571 = vst.msk [vmem:[#allocation2 + $0x60] sm:$0xff] %vm2558_vm9, %v2535_v43  ;;  %v2519_v44 = vpop.permute.xlu0 %2518 }
 0x129   : > { %2563 = vst.msk [vmem:[#allocation2 + $0x20] sm:$0xff] %vm2558_vm9, %v2519_v44 }
 0x12b   : > { %v2824_v45 = vpop.permute.xlu1 %2823 }
 0x12c   : > { %2860 = vst.msk [vmem:[#allocation2 + $0x60] sm:$0xff] %vm2847_vm10, %v2824_v45  ;;  %v2808_v46 = vpop.permute.xlu0 %2807 }
 0x12d   : > { %2852 = vst.msk [vmem:[#allocation2 + $0x20] sm:$0xff] %vm2847_vm10, %v2808_v46 }
 0x12f   : > { %v730_v47 = vpop.permute.xlu1 %729 }
 0x130   : > { %765 = vst.msk [vmem:[#allocation2 + $0x68] sm:$0xff] %vm751_vm3, %v730_v47  ;;  %v714_v48 = vpop.permute.xlu0 %713 }
 0x131   : > { %757 = vst.msk [vmem:[#allocation2 + $0x28] sm:$0xff] %vm751_vm3, %v714_v48 }
 0x133   : > { %v2876_v49 = vld [vmem:[#allocation2 + $0x60] sm:$0xff]  ;;  %v1020_v50 = vpop.permute.xlu1 %1019 }
 0x134   : > { %3613 = vmatprep.subr.msk.bf16.mxu0 %vm2887_vm11, %v2876_v49  ;;  %v2868_v51 = vld [vmem:[#allocation2 + $0x20] sm:$0xff]  ;;  %1055 = vst.msk [vmem:[#allocation2 + $0x68] sm:$0xff] %vm1041_vm4, %v1020_v50  ;;  %v1004_v53 = vpop.permute.xlu0 %1003 }
 0x135   : > { %v2904_v52 = vsel %vm2887_vm11, %v2868_v51, 0  ;;  %1047 = vst.msk [vmem:[#allocation2 + $0x28] sm:$0xff] %vm1041_vm4, %v1004_v53 }
 0x136   : > { %3600 = vmatpush3.bf16.xpose.msra.mxu0 %v2904_v52 }
 0x137   : > { %v1201_v54 = vpop.permute.xlu1 %1200 }
 0x138   : > { %1236 = vst.msk [vmem:[#allocation2 + $0x68] sm:$0xff] %vm1222_vm5, %v1201_v54  ;;  %v1185_v55 = vpop.permute.xlu0 %1184 }
 0x139   : > { %1228 = vst.msk [vmem:[#allocation2 + $0x28] sm:$0xff] %vm1222_vm5, %v1185_v55 }
 0x13b   : > { %v1634_v56 = vpop.permute.xlu1 %1633 }
 0x13c   : > { %1669 = vst.msk [vmem:[#allocation2 + $0x68] sm:$0xff] %vm1655_vm6, %v1634_v56  ;;  %v1618_v57 = vpop.permute.xlu0 %1617 }
 0x13d   : > { %1661 = vst.msk [vmem:[#allocation2 + $0x28] sm:$0xff] %vm1655_vm6, %v1618_v57 }
 0x13f   : > { %v1923_v58 = vpop.permute.xlu1 %1922 }
 0x140   : > { %1958 = vst.msk [vmem:[#allocation2 + $0x68] sm:$0xff] %vm1944_vm7, %v1923_v58  ;;  %v1907_v59 = vpop.permute.xlu0 %1906 }
 0x141   : > { %1950 = vst.msk [vmem:[#allocation2 + $0x28] sm:$0xff] %vm1944_vm7, %v1907_v59 }
 0x143   : > { %v2104_v60 = vpop.permute.xlu1 %2103 }
 0x144   : > { %2139 = vst.msk [vmem:[#allocation2 + $0x68] sm:$0xff] %vm2125_vm8, %v2104_v60  ;;  %v2088_v61 = vpop.permute.xlu0 %2087 }
 0x145   : > { %2131 = vst.msk [vmem:[#allocation2 + $0x28] sm:$0xff] %vm2125_vm8, %v2088_v61 }
 0x147   : > { %v2537_v62 = vpop.permute.xlu1 %2536 }
 0x148   : > { %2572 = vst.msk [vmem:[#allocation2 + $0x68] sm:$0xff] %vm2558_vm9, %v2537_v62  ;;  %v2521_v63 = vpop.permute.xlu0 %2520 }
 0x149   : > { %2564 = vst.msk [vmem:[#allocation2 + $0x28] sm:$0xff] %vm2558_vm9, %v2521_v63 }
 0x14b   : > { %v2826_v0 = vpop.permute.xlu1 %2825 }
 0x14c   : > { %2861 = vst.msk [vmem:[#allocation2 + $0x68] sm:$0xff] %vm2847_vm10, %v2826_v0  ;;  %v2810_v1 = vpop.permute.xlu0 %2809 }
 0x14d   : > { %2853 = vst.msk [vmem:[#allocation2 + $0x28] sm:$0xff] %vm2847_vm10, %v2810_v1 }
 0x14f   : > { %v732_v2 = vpop.permute.xlu1 %731 }
 0x150   : > { %766 = vst.msk [vmem:[#allocation2 + $0x70] sm:$0xff] %vm751_vm3, %v732_v2  ;;  %v716_v3 = vpop.permute.xlu0 %715 }
 0x151   : > { %758 = vst.msk [vmem:[#allocation2 + $0x30] sm:$0xff] %vm751_vm3, %v716_v3 }
 0x153   : > { %v2877_v4 = vld [vmem:[#allocation2 + $0x68] sm:$0xff]  ;;  %v1022_v5 = vpop.permute.xlu1 %1021 }
 0x154   : > { %3614 = vmatprep.subr.msk.bf16.mxu0 %vm2887_vm11, %v2877_v4  ;;  %1056 = vst.msk [vmem:[#allocation2 + $0x70] sm:$0xff] %vm1041_vm4, %v1022_v5  ;;  %v2869_v7 = vld [vmem:[#allocation2 + $0x28] sm:$0xff]  ;;  %v1006_v8 = vpop.permute.xlu0 %1005 }
 0x155   : > { %v2907_v9 = vsel %vm2887_vm11, %v2869_v7, 0  ;;  %1048 = vst.msk [vmem:[#allocation2 + $0x30] sm:$0xff] %vm1041_vm4, %v1006_v8 }
 0x156   : > { %3602 = vmatpush3.bf16.xpose.msra.mxu0 %v2907_v9 }
 0x157   : > { %v1203_v10 = vpop.permute.xlu1 %1202 }
 0x158   : > { %1237 = vst.msk [vmem:[#allocation2 + $0x70] sm:$0xff] %vm1222_vm5, %v1203_v10  ;;  %v1187_v11 = vpop.permute.xlu0 %1186 }
 0x159   : > { %1229 = vst.msk [vmem:[#allocation2 + $0x30] sm:$0xff] %vm1222_vm5, %v1187_v11 }
 0x15b   : > { %v1636_v12 = vpop.permute.xlu1 %1635 }
 0x15c   : > { %1670 = vst.msk [vmem:[#allocation2 + $0x70] sm:$0xff] %vm1655_vm6, %v1636_v12  ;;  %v1620_v6 = vpop.permute.xlu0 %1619 }
 0x15d   : > { %1662 = vst.msk [vmem:[#allocation2 + $0x30] sm:$0xff] %vm1655_vm6, %v1620_v6 }
 0x15f   : > { %v1925_v13 = vpop.permute.xlu1 %1924 }
 0x160   : > { %1959 = vst.msk [vmem:[#allocation2 + $0x70] sm:$0xff] %vm1944_vm7, %v1925_v13  ;;  %v1909_v14 = vpop.permute.xlu0 %1908 }
 0x161   : > { %1951 = vst.msk [vmem:[#allocation2 + $0x30] sm:$0xff] %vm1944_vm7, %v1909_v14 }
 0x163   : > { %v2106_v15 = vpop.permute.xlu1 %2105 }
 0x164   : > { %2140 = vst.msk [vmem:[#allocation2 + $0x70] sm:$0xff] %vm2125_vm8, %v2106_v15  ;;  %v2090_v16 = vpop.permute.xlu0 %2089 }
 0x165   : > { %2132 = vst.msk [vmem:[#allocation2 + $0x30] sm:$0xff] %vm2125_vm8, %v2090_v16 }
 0x167   : > { %v2539_v17 = vpop.permute.xlu1 %2538 }
 0x168   : > { %2573 = vst.msk [vmem:[#allocation2 + $0x70] sm:$0xff] %vm2558_vm9, %v2539_v17  ;;  %v2523_v18 = vpop.permute.xlu0 %2522 }
 0x169   : > { %2565 = vst.msk [vmem:[#allocation2 + $0x30] sm:$0xff] %vm2558_vm9, %v2523_v18 }
 0x16b   : > { %v2828_v19 = vpop.permute.xlu1 %2827 }
 0x16c   : > { %2862 = vst.msk [vmem:[#allocation2 + $0x70] sm:$0xff] %vm2847_vm10, %v2828_v19  ;;  %v2812_v20 = vpop.permute.xlu0 %2811 }
 0x16d   : > { %2854 = vst.msk [vmem:[#allocation2 + $0x30] sm:$0xff] %vm2847_vm10, %v2812_v20 }
 0x16f   : > { %v734_v21 = vpop.permute.xlu1 %733 }
 0x170   : > { %767 = vst.msk [vmem:[#allocation2 + $0x78] sm:$0xff] %vm751_vm3, %v734_v21  ;;  %v718_v22 = vpop.permute.xlu0 %717 }
 0x171   : > { %759 = vst.msk [vmem:[#allocation2 + $0x38] sm:$0xff] %vm751_vm3, %v718_v22 }
 0x173   : > { %v2878_v23 = vld [vmem:[#allocation2 + $0x70] sm:$0xff]  ;;  %v1024_v24 = vpop.permute.xlu1 %1023 }
 0x174   : > { %3615 = vmatprep.subr.msk.bf16.mxu0 %vm2887_vm11, %v2878_v23  ;;  %1057 = vst.msk [vmem:[#allocation2 + $0x78] sm:$0xff] %vm1041_vm4, %v1024_v24  ;;  %v2870_v25 = vld [vmem:[#allocation2 + $0x30] sm:$0xff]  ;;  %v1008_v27 = vpop.permute.xlu0 %1007 }
 0x175   : > { %v2910_v26 = vsel %vm2887_vm11, %v2870_v25, 0  ;;  %1049 = vst.msk [vmem:[#allocation2 + $0x38] sm:$0xff] %vm1041_vm4, %v1008_v27 }
 0x176   : > { %3604 = vmatpush3.bf16.xpose.msra.mxu0 %v2910_v26 }
 0x177   : > { %v1205_v28 = vpop.permute.xlu1 %1204 }
 0x178   : > { %1238 = vst.msk [vmem:[#allocation2 + $0x78] sm:$0xff] %vm1222_vm5, %v1205_v28  ;;  %v1189_v29 = vpop.permute.xlu0 %1188 }
 0x179   : > { %1230 = vst.msk [vmem:[#allocation2 + $0x38] sm:$0xff] %vm1222_vm5, %v1189_v29 }
 0x17b   : > { %v1638_v30 = vpop.permute.xlu1 %1637 }
 0x17c   : > { %1671 = vst.msk [vmem:[#allocation2 + $0x78] sm:$0xff] %vm1655_vm6, %v1638_v30  ;;  %v1622_v31 = vpop.permute.xlu0 %1621 }
 0x17d   : > { %1663 = vst.msk [vmem:[#allocation2 + $0x38] sm:$0xff] %vm1655_vm6, %v1622_v31 }
 0x17f   : > { %v1927_v32 = vpop.permute.xlu1 %1926 }
 0x180   : > { %1960 = vst.msk [vmem:[#allocation2 + $0x78] sm:$0xff] %vm1944_vm7, %v1927_v32  ;;  %v1911_v33 = vpop.permute.xlu0 %1910 }
 0x181   : > { %1952 = vst.msk [vmem:[#allocation2 + $0x38] sm:$0xff] %vm1944_vm7, %v1911_v33 }
 0x183   : > { %v2108_v34 = vpop.permute.xlu1 %2107 }
 0x184   : > { %2141 = vst.msk [vmem:[#allocation2 + $0x78] sm:$0xff] %vm2125_vm8, %v2108_v34  ;;  %v2092_v35 = vpop.permute.xlu0 %2091 }
 0x185   : > { %2133 = vst.msk [vmem:[#allocation2 + $0x38] sm:$0xff] %vm2125_vm8, %v2092_v35 }
 0x187   : > { %v2541_v36 = vpop.permute.xlu1 %2540 }
 0x188   : > { %2574 = vst.msk [vmem:[#allocation2 + $0x78] sm:$0xff] %vm2558_vm9, %v2541_v36  ;;  %v2525_v37 = vpop.permute.xlu0 %2524 }
 0x189   : > { %2566 = vst.msk [vmem:[#allocation2 + $0x38] sm:$0xff] %vm2558_vm9, %v2525_v37 }
 0x18b   : > { %v2830_v39 = vpop.permute.xlu1 %2829 }
 0x18c   : > { %2863 = vst.msk [vmem:[#allocation2 + $0x78] sm:$0xff] %vm2847_vm10, %v2830_v39  ;;  %v2814_v40 = vpop.permute.xlu0 %2813 }
 0x18d   : > { %2855 = vst.msk [vmem:[#allocation2 + $0x38] sm:$0xff] %vm2847_vm10, %v2814_v40 }
 0x193   : > { %v2879_v41 = vld [vmem:[#allocation2 + $0x78] sm:$0xff] }
 0x194   : > { %3616 = vmatprep.subr.msk.bf16.mxu0 %vm2887_vm11, %v2879_v41  ;;  %v2871_v42 = vld [vmem:[#allocation2 + $0x38] sm:$0xff] }
 0x195   : > { %v2913_v43 = vsel %vm2887_vm11, %v2871_v42, 0 }
 0x196   : > { %3606 = vmatpush3.bf16.xpose.msra.mxu0 %v2913_v43 }
 0x19d   : > { %3608 = vmatmul.mubr.msk.bf16.vlgmr.msra.gmra.mrb[0].mxu0 %vm2887_vm11, %v4663_v38  ;;  %v2885_v44 = vpop.permute.xlu0 %2884 }
 0x270   : > { %v2973_v45 = vpop.f32.mrb[0].mxu0 }
 0x271   : > { %v2974_v46 = vadd.f32 %v2973_v45, %v2885_v44  ;;  %v2975_v47 = vpop.f32.mrb[1].mxu0 }
 0x272   : > { %v2976_v48 = vadd.f32 %v2975_v47, %v2885_v44  ;;  %v2977_v49 = vpop.f32.mrb[2].mxu0 }
 0x273   : > { %v2980_v50 = vmax.f32 %v2974_v46, 0.0  ;;  %v2978_v51 = vpop.f32.mrb[3].mxu0 }
 0x274   : > { %v2981_v52 = vmax.f32 %v2976_v48, 0.0 }
 0x275   : > { %2982 = vst [vmem:[%s177_s29] sm:$0xff] %v2980_v50 }
 0x276   : > { %2983 = vst [vmem:[%s177_s29 + $0x8] sm:$0xff] %v2981_v52 }
 0x277   : > { %3936 = shalt.err (!%p3933_p5)
}
 0x278   : > { %s3937_s11 = scalar_lea.hbm %s4742_s6, 256  ;;  %s3941_s21 = scalar_lea.hbm %s4792_s3, 512 }
 0x279   : > { %p3938_p6 = scmp.ne.s32.totalorder %s4742_s6, %s3937_s11  ;;  %p3942_p10 = scmp.lt.u32.totalorder %s4742_s6, %s4792_s3 }
 0x27a   : > { %p3943_p11 = scmp.lt.u32.totalorder %s3941_s21, %s3937_s11  ;;  %p3945_p13 = scmp.lt.u32.totalorder %s3937_s11, %s4742_s6 }
 0x27b   : > { %p3939_p7 = pnand %p3938_p6, %p4073_p4 }
 0x27c   : > { %p3944_p12 = por %p3943_p11, %p3942_p10 }
 0x27d   : > { %p3940_p9 = pneg %p3939_p7 }
 0x27e   : > { %p3946_p0 = por %p3945_p13, %p3944_p12 }
 0x280   : > { %p3947_p1 = pnand %p3946_p0, %p3940_p9 }
 0x282   : > { %3950 = shalt.err (!%p3947_p1)
}
 0x283   : > { %3618 = dma.vmem_to_hbm [thread:$0]  (%p4073_p4), %s4744_s30, 256, %s4742_s6, %s2985_s15  }
 0x284 PF: > { %p3624_p2 = scmp.ge.s32.totalorder %s4001_s17, 2  ;;  %s3013_s27 = sand.u32 1, %s3981_s12  }
 0x285   : > { %s3014_s28 = scalar_lea.sflag [#allocation4], %s3013_s27 }
 0x286   : > { %p3621_p3 = pnand %p3624_p2, %p4080_p8 }
 0x288   : > { %3976 = dma.done.wait (!%p3621_p3), %s3014_s28, 256  }
 0x289   : > { %3978 = vsyncadd (!%p3621_p3), %s3014_s28, 4294967040  ;;  %s16_s17 = sadd.s32 1, %s4001_s17   ;;  %s4795_s12 = smov %s3985_s13 }
 0x28a   : > { %p13_p5 = scmp.ge.s32.totalorder %s16_s17, 4   ;;  %s4796_s13 = smov %s3989_s14 }
 0x28b   : > { %s4797_s14 = smov %s4086_s25  ;;  %s4798_s15 = smov %s3997_s16 }
 0x28c   : > { %s4799_s16 = smov %s4801_s20  ;;  %15 = sbr.rel (!%p13_p5) target bundleno = 4 (0x4), region = 70 }
 0x293   :  { %3019 = vsyncpa [#allocation4], 1 }
 0x294   :  { %3021 = vsyncpa [#allocation4 + $0x1], 1 }

</bundles_post_ra>
